<compile_context>
chip_gen: v7x
topology: tpu7x:2x2x1
jax: 0.10.0
libtpu: 0.0.40
codegen_flags: <defaults>
</compile_context>

<pallas_src>
import functools

import jax
import jax.numpy as jnp
from jax import lax
from jax.experimental import pallas as pl
from jax.experimental.pallas import tpu as pltpu

# ---- model config (stand-in for the MODEL dict in the original repo) --------
MODEL = {
    "input_size": 8,
    "hidden_size": 32,
    "num_layers": 2,
    "output_size": 4,
    "dropout": 0.2,   # train-time only between layers; inference forward = identity
}

_SUBLANE = 8
_LANE = 128


# -----------------------------------------------------------------------------
# Fused Pallas kernel: all LSTM layers + time loop + final FC in one invocation
# -----------------------------------------------------------------------------
def _fused_lstm_fc_kernel(num_layers, *refs):
    """Ref layout (all full VMEM blocks, grid=()):

      refs[0]                    x       (T*Bp, D)     time-major, batch-padded input
      refs[1+3l : 4+3l]          layer l: w_ih (Din,4H), w_hh (H,4H), bias (1,4H)
                                 gate columns in kernel order [i, f, o, g]
      refs[1+3L], refs[2+3L]     fc_w (H, Op), fc_b (1, Op)   (lane-padded to 128)
      refs[3+3L]                 out     (Bp, Op)
      refs[4+3L]                 pre_sc  (T*Bp, 4H) f32 scratch (pre-activations)
      refs[5+3L]                 hseq_sc (T*Bp, H)  f32 scratch (inter-layer h-seq)
    """
    x_ref = refs[0]
    fcw_ref = refs[1 + 3 * num_layers]
    fcb_ref = refs[2 + 3 * num_layers]
    out_ref = refs[3 + 3 * num_layers]
    pre_sc = refs[4 + 3 * num_layers]
    hseq_sc = refs[5 + 3 * num_layers]

    Bp = out_ref.shape[0]
    T = x_ref.shape[0] // Bp
    H = hseq_sc.shape[-1]
    H3 = 3 * H

    def cell(pre_t, h_prev, c_prev, whh_ref):
        # pre_t already contains x_t @ W_ih + (b_ih + b_hh)
        gates = pre_t + jnp.dot(h_prev, whh_ref[...],
                                preferred_element_type=jnp.float32)
        s = jax.nn.sigmoid(gates[:, :H3])      # contiguous [i | f | o]
        i_g = s[:, 0:H]
        f_g = s[:, H:2 * H]
        o_g = s[:, 2 * H:H3]
        g_g = jnp.tanh(gates[:, H3:])
        c_new = f_g * c_prev + i_g * g_g
        h_new = o_g * jnp.tanh(c_new)
        return h_new, c_new

    zeros = jnp.zeros((Bp, H), jnp.float32)
    h_last = zeros
    layer_in_ref = x_ref
    for layer in range(num_layers):                       # static Python unroll over layers
        wih_ref = refs[1 + 3 * layer]
        whh_ref = refs[2 + 3 * layer]
        b_ref = refs[3 + 3 * layer]

        # Hoisted input projection for ALL timesteps: one MXU pass + one bias broadcast.
        pre_sc[...] = (
            jnp.dot(layer_in_ref[...].astype(jnp.float32), wih_ref[...],
                    preferred_element_type=jnp.float32)
            + b_ref[...]
        )

        def body(t, carry, whh_ref=whh_ref):
            h_prev, c_prev = carry
            row = pl.multiple_of(t * Bp, Bp)
            h_new, c_new = cell(pre_sc[pl.ds(row, Bp), :], h_prev, c_prev, whh_ref)
            hseq_sc[pl.ds(row, Bp), :] = h_new            # input sequence for next layer
            return h_new, c_new

        h_last, _ = lax.fori_loop(0, T, body, (zeros, zeros), unroll=True)

        # TODO(synk): inter-layer dropout is train-time only; eval forward is identity.
        layer_in_ref = hseq_sc

    # Final FC on the last timestep's hidden state; lane-dense (Bp, 128) store.
    out_ref[...] = (
        jnp.dot(h_last, fcw_ref[...], preferred_element_type=jnp.float32)
        + fcb_ref[...]
    ).astype(out_ref.dtype)


def _fused_forward_call(x_flat, layer_params, fc_w, fc_b, *, T, Bp):
    num_layers = len(layer_params)
    H = layer_params[0][1].shape[0]     # w_hh: (H, 4H)
    Op = fc_w.shape[1]

    operands = [x_flat]
    in_specs = [pl.BlockSpec(x_flat.shape, lambda: (0, 0))]
    for (w_ih, w_hh, b) in layer_params:
        operands += [w_ih, w_hh, b]
        in_specs += [
            pl.BlockSpec(w_ih.shape, lambda: (0, 0)),
            pl.BlockSpec(w_hh.shape, lambda: (0, 0)),
            pl.BlockSpec(b.shape, lambda: (0, 0)),
        ]
    operands += [fc_w, fc_b]
    in_specs += [
        pl.BlockSpec(fc_w.shape, lambda: (0, 0)),
        pl.BlockSpec(fc_b.shape, lambda: (0, 0)),
    ]

    return pl.pallas_call(
        functools.partial(_fused_lstm_fc_kernel, num_layers),
        out_shape=jax.ShapeDtypeStruct((Bp, Op), jnp.float32),
        grid=(),
        in_specs=in_specs,
        out_specs=pl.BlockSpec((Bp, Op), lambda: (0, 0)),
        scratch_shapes=[
            pltpu.VMEM((T * Bp, 4 * H), jnp.float32),   # hoisted pre-activations
            pltpu.VMEM((T * Bp, H), jnp.float32),       # inter-layer hidden sequence
        ],
    )(*operands)


# -----------------------------------------------------------------------------
# Parameter handling
# -----------------------------------------------------------------------------
def init_params(key, input_size, hidden_size, num_layers, output_size):
    """PyTorch-style U(-1/sqrt(H), 1/sqrt(H)) init.

    Stored in x @ W convention with PyTorch gate column order [i, f, g, o];
    per-layer bias is the fused b_ih + b_hh.
    """
    params = {"lstm": [], "fc": {}}
    k = 1.0 / float(hidden_size) ** 0.5
    for layer in range(num_layers):
        d_in = input_size if layer == 0 else hidden_size
        key, k1, k2, k3, k4 = jax.random.split(key, 5)
        w_ih = jax.random.uniform(k1, (d_in, 4 * hidden_size), jnp.float32, -k, k)
        w_hh = jax.random.uniform(k2, (hidden_size, 4 * hidden_size), jnp.float32, -k, k)
        b_ih = jax.random.uniform(k3, (4 * hidden_size,), jnp.float32, -k, k)
        b_hh = jax.random.uniform(k4, (4 * hidden_size,), jnp.float32, -k, k)
        params["lstm"].append({"w_ih": w_ih, "w_hh": w_hh, "bias": b_ih + b_hh})
    key, k1, k2 = jax.random.split(key, 3)
    params["fc"]["w"] = jax.random.uniform(k1, (hidden_size, output_size), jnp.float32, -k, k)
    params["fc"]["b"] = jax.random.uniform(k2, (output_size,), jnp.float32, -k, k)
    return params


def _reorder_gates(w, H):
    """Permute gate columns PyTorch [i, f, g, o] -> kernel [i, f, o, g]."""
    i, f, g, o = (w[..., j * H:(j + 1) * H] for j in range(4))
    return jnp.concatenate([i, f, o, g], axis=-1)


def _round_up(n, m):
    return ((n + m - 1) // m) * m


@jax.jit
def lstm_classifier_forward(params, x_btd):
    """x_btd: (B, T, D) -> (B, output_size). Matches PyTorch forward (eval mode)."""
    B, T, D = x_btd.shape
    H = params["lstm"][0]["w_hh"].shape[0]
    O = params["fc"]["w"].shape[1]

    Bp = _round_up(max(B, _SUBLANE), _SUBLANE)     # batch padded to sublane count
    Op = _round_up(max(O, _LANE), _LANE)           # logits padded to a full lane slab

    # time-major, batch-padded, flattened to (T*Bp, D) so the per-layer input
    # projection is a single matmul over all timesteps.
    x_tbd = jnp.transpose(x_btd.astype(jnp.float32), (1, 0, 2))
    x_pad = jnp.zeros((T, Bp, D), jnp.float32).at[:, :B, :].set(x_tbd)
    x_flat = x_pad.reshape(T * Bp, D)

    layer_params = []
    for lp in params["lstm"]:
        layer_params.append((
            _reorder_gates(lp["w_ih"], H),
            _reorder_gates(lp["w_hh"], H),
            _reorder_gates(lp["bias"].reshape(1, -1), H),
        ))

    fc_w = jnp.zeros((H, Op), jnp.float32).at[:, :O].set(params["fc"]["w"])
    fc_b = jnp.zeros((1, Op), jnp.float32).at[:, :O].set(params["fc"]["b"].reshape(1, -1))

    out_pad = _fused_forward_call(x_flat, layer_params, fc_w, fc_b, T=T, Bp=Bp)
    return out_pad[:B, :O]


# -----------------------------------------------------------------------------
# Pure-JAX reference (no Pallas) for correctness checking
# -----------------------------------------------------------------------------
def reference_forward(params, x_btd):
    B, T, D = x_btd.shape
    H = params["lstm"][0]["w_hh"].shape[0]
    seq = jnp.transpose(x_btd.astype(jnp.float32), (1, 0, 2))   # (T, B, D)
    for lp in params["lstm"]:
        w_ih, w_hh, bias = lp["w_ih"], lp["w_hh"], lp["bias"]

        def step(carry, x_t, w_ih=w_ih, w_hh=w_hh, bias=bias):
            h, c = carry
            gates = x_t @ w_ih + h @ w_hh + bias                # PyTorch order [i,f,g,o]
            i = jax.nn.sigmoid(gates[:, 0 * H:1 * H])
            f = jax.nn.sigmoid(gates[:, 1 * H:2 * H])
            g = jnp.tanh(gates[:, 2 * H:3 * H])
            o = jax.nn.sigmoid(gates[:, 3 * H:4 * H])
            c = f * c + i * g
            h = o * jnp.tanh(c)
            return (h, c), h

        init = (jnp.zeros((B, H), jnp.float32), jnp.zeros((B, H), jnp.float32))
        _, seq = lax.scan(step, init, seq)
    final_hidden = seq[-1]                                      # == lstm_out[:, -1, :]
    return final_hidden @ params["fc"]["w"] + params["fc"]["b"][None, :]


# -----------------------------------------------------------------------------
if __name__ == "__main__":
    B, T = 2, 8
    D = MODEL["input_size"]
    H = MODEL["hidden_size"]
    L = MODEL["num_layers"]
    O = MODEL["output_size"]

    key = jax.random.PRNGKey(0)
    pkey, xkey = jax.random.split(key)
    params = init_params(pkey, D, H, L, O)
    x = jax.random.normal(xkey, (B, T, D), dtype=jnp.float32)

    out = jax.block_until_ready(lstm_classifier_forward(params, x))
    assert out.shape == (B, O), out.shape

    ref = jax.block_until_ready(reference_forward(params, x))
    assert jnp.allclose(out, ref, atol=1e-4, rtol=1e-4), (out, ref)

    print("KERNEL_OK")
</pallas_src>

<mosaic_0001>
module attributes {stable_mosaic.version = 11 : i64} {
  func.func @_fused_lstm_fc_kernel(%arg0: memref<64x8xf32, #tpu.memory_space<vmem>>, %arg1: memref<8x128xf32, #tpu.memory_space<vmem>>, %arg2: memref<32x128xf32, #tpu.memory_space<vmem>>, %arg3: memref<1x128xf32, #tpu.memory_space<vmem>>, %arg4: memref<32x128xf32, #tpu.memory_space<vmem>>, %arg5: memref<32x128xf32, #tpu.memory_space<vmem>>, %arg6: memref<1x128xf32, #tpu.memory_space<vmem>>, %arg7: memref<32x128xf32, #tpu.memory_space<vmem>>, %arg8: memref<1x128xf32, #tpu.memory_space<vmem>>, %arg9: memref<8x128xf32, #tpu.memory_space<vmem>>, %arg10: memref<64x128xf32, #tpu.memory_space<vmem>>, %arg11: memref<64x32xf32, #tpu.memory_space<vmem>>) attributes {dimension_semantics = [], scalar_prefetch = 0 : i64, scratch_operands = 2 : i64, tpu.core_type = #tpu.core_type<tc>} {
    %cst = arith.constant 0.000000e+00 : f32
    %0 = vector.broadcast %cst : f32 to vector<8x32xf32>
    %c0 = arith.constant 0 : index
    %c0_0 = arith.constant 0 : index
    %1 = vector.load %arg0[%c0, %c0_0] : memref<64x8xf32, #tpu.memory_space<vmem>>, vector<64x8xf32>
    %c0_1 = arith.constant 0 : index
    %c0_2 = arith.constant 0 : index
    %2 = vector.load %arg1[%c0_1, %c0_2] : memref<8x128xf32, #tpu.memory_space<vmem>>, vector<8x128xf32>
    %cst_3 = arith.constant dense<0.000000e+00> : vector<64x128xf32>
    %3 = tpu.matmul %1, %2, %cst_3 {dimension_numbers = #tpu.dot_dimension_numbers<[1], [0], [0], [1], [0, 0, 1, 1], [], []>} : vector<64x8xf32>, vector<8x128xf32>, vector<64x128xf32> -> vector<64x128xf32>
    %c0_4 = arith.constant 0 : index
    %c0_5 = arith.constant 0 : index
    %4 = vector.load %arg3[%c0_4, %c0_5] : memref<1x128xf32, #tpu.memory_space<vmem>>, vector<1x128xf32>
    %5 = vector.broadcast %4 : vector<1x128xf32> to vector<64x128xf32>
    %6 = arith.addf %3, %5 : vector<64x128xf32>
    %c0_6 = arith.constant 0 : index
    %c0_7 = arith.constant 0 : index
    %7 = vector.load %arg10[%c0_6, %c0_7] : memref<64x128xf32, #tpu.memory_space<vmem>>, vector<64x128xf32>
    tpu.vector_store %arg10[%c0_6, %c0_7], %6 {strides = array<i32>} : memref<64x128xf32, #tpu.memory_space<vmem>>, vector<64x128xf32>,
    %c0_i32 = arith.constant 0 : i32
    %c8_i32 = arith.constant 8 : i32
    %8 = arith.muli %c0_i32, %c8_i32 : i32
    %9 = tpu.assume_multiple %8, 8 : i32
    %10 = arith.index_cast %9 : i32 to index
    %c0_8 = arith.constant 0 : index
    %11 = vector.load %arg10[%10, %c0_8] : memref<64x128xf32, #tpu.memory_space<vmem>>, vector<8x128xf32>
    %c0_9 = arith.constant 0 : index
    %c0_10 = arith.constant 0 : index
    %12 = vector.load %arg2[%c0_9, %c0_10] : memref<32x128xf32, #tpu.memory_space<vmem>>, vector<32x128xf32>
    %cst_11 = arith.constant dense<0.000000e+00> : vector<8x128xf32>
    %13 = tpu.matmul %0, %12, %cst_11 {dimension_numbers = #tpu.dot_dimension_numbers<[1], [0], [0], [1], [0, 0, 1, 1], [], []>} : vector<8x32xf32>, vector<32x128xf32>, vector<8x128xf32> -> vector<8x128xf32>
    %14 = arith.addf %11, %13 : vector<8x128xf32>
    %15 = vector.extract_strided_slice %14 {offsets = [0, 0], sizes = [8, 96], strides = [1, 1]} : vector<8x128xf32> to vector<8x96xf32>
    %16 = arith.negf %15 : vector<8x96xf32>
    %17 = math.exp %16 : vector<8x96xf32>
    %cst_12 = arith.constant 1.000000e+00 : f32
    %18 = vector.broadcast %cst_12 : f32 to vector<8x96xf32>
    %19 = arith.addf %18, %17 : vector<8x96xf32>
    %20 = arith.divf %18, %19 : vector<8x96xf32>
    %21 = vector.extract_strided_slice %20 {offsets = [0, 0], sizes = [8, 32], strides = [1, 1]} : vector<8x96xf32> to vector<8x32xf32>
    %22 = vector.extract_strided_slice %20 {offsets = [0, 32], sizes = [8, 32], strides = [1, 1]} : vector<8x96xf32> to vector<8x32xf32>
    %23 = vector.extract_strided_slice %20 {offsets = [0, 64], sizes = [8, 32], strides = [1, 1]} : vector<8x96xf32> to vector<8x32xf32>
    %24 = vector.extract_strided_slice %14 {offsets = [0, 96], sizes = [8, 32], strides = [1, 1]} : vector<8x128xf32> to vector<8x32xf32>
    %25 = math.tanh %24 : vector<8x32xf32>
    %26 = arith.mulf %22, %0 : vector<8x32xf32>
    %27 = arith.mulf %21, %25 : vector<8x32xf32>
    %28 = arith.addf %26, %27 : vector<8x32xf32>
    %29 = math.tanh %28 : vector<8x32xf32>
    %30 = arith.mulf %23, %29 : vector<8x32xf32>
    %31 = arith.index_cast %9 : i32 to index
    %c0_13 = arith.constant 0 : index
    %32 = vector.load %arg11[%31, %c0_13] : memref<64x32xf32, #tpu.memory_space<vmem>>, vector<8x32xf32>
    tpu.vector_store %arg11[%31, %c0_13], %30 {strides = array<i32>} : memref<64x32xf32, #tpu.memory_space<vmem>>, vector<8x32xf32>,
    %c1_i32 = arith.constant 1 : i32
    %c8_i32_14 = arith.constant 8 : i32
    %33 = arith.muli %c1_i32, %c8_i32_14 : i32
    %34 = tpu.assume_multiple %33, 8 : i32
    %35 = arith.index_cast %34 : i32 to index
    %c0_15 = arith.constant 0 : index
    %36 = vector.load %arg10[%35, %c0_15] : memref<64x128xf32, #tpu.memory_space<vmem>>, vector<8x128xf32>
    %c0_16 = arith.constant 0 : index
    %c0_17 = arith.constant 0 : index
    %37 = vector.load %arg2[%c0_16, %c0_17] : memref<32x128xf32, #tpu.memory_space<vmem>>, vector<32x128xf32>
    %cst_18 = arith.constant dense<0.000000e+00> : vector<8x128xf32>
    %38 = tpu.matmul %30, %37, %cst_18 {dimension_numbers = #tpu.dot_dimension_numbers<[1], [0], [0], [1], [0, 0, 1, 1], [], []>} : vector<8x32xf32>, vector<32x128xf32>, vector<8x128xf32> -> vector<8x128xf32>
    %39 = arith.addf %36, %38 : vector<8x128xf32>
    %40 = vector.extract_strided_slice %39 {offsets = [0, 0], sizes = [8, 96], strides = [1, 1]} : vector<8x128xf32> to vector<8x96xf32>
    %41 = arith.negf %40 : vector<8x96xf32>
    %42 = math.exp %41 : vector<8x96xf32>
    %cst_19 = arith.constant 1.000000e+00 : f32
    %43 = vector.broadcast %cst_19 : f32 to vector<8x96xf32>
    %44 = arith.addf %43, %42 : vector<8x96xf32>
    %45 = arith.divf %43, %44 : vector<8x96xf32>
    %46 = vector.extract_strided_slice %45 {offsets = [0, 0], sizes = [8, 32], strides = [1, 1]} : vector<8x96xf32> to vector<8x32xf32>
    %47 = vector.extract_strided_slice %45 {offsets = [0, 32], sizes = [8, 32], strides = [1, 1]} : vector<8x96xf32> to vector<8x32xf32>
    %48 = vector.extract_strided_slice %45 {offsets = [0, 64], sizes = [8, 32], strides = [1, 1]} : vector<8x96xf32> to vector<8x32xf32>
    %49 = vector.extract_strided_slice %39 {offsets = [0, 96], sizes = [8, 32], strides = [1, 1]} : vector<8x128xf32> to vector<8x32xf32>
    %50 = math.tanh %49 : vector<8x32xf32>
    %51 = arith.mulf %47, %28 : vector<8x32xf32>
    %52 = arith.mulf %46, %50 : vector<8x32xf32>
    %53 = arith.addf %51, %52 : vector<8x32xf32>
    %54 = math.tanh %53 : vector<8x32xf32>
    %55 = arith.mulf %48, %54 : vector<8x32xf32>
    %56 = arith.index_cast %34 : i32 to index
    %c0_20 = arith.constant 0 : index
    %57 = vector.load %arg11[%56, %c0_20] : memref<64x32xf32, #tpu.memory_space<vmem>>, vector<8x32xf32>
    tpu.vector_store %arg11[%56, %c0_20], %55 {strides = array<i32>} : memref<64x32xf32, #tpu.memory_space<vmem>>, vector<8x32xf32>,
    %c2_i32 = arith.constant 2 : i32
    %c8_i32_21 = arith.constant 8 : i32
    %58 = arith.muli %c2_i32, %c8_i32_21 : i32
    %59 = tpu.assume_multiple %58, 8 : i32
    %60 = arith.index_cast %59 : i32 to index
    %c0_22 = arith.constant 0 : index
    %61 = vector.load %arg10[%60, %c0_22] : memref<64x128xf32, #tpu.memory_space<vmem>>, vector<8x128xf32>
    %c0_23 = arith.constant 0 : index
    %c0_24 = arith.constant 0 : index
    %62 = vector.load %arg2[%c0_23, %c0_24] : memref<32x128xf32, #tpu.memory_space<vmem>>, vector<32x128xf32>
    %cst_25 = arith.constant dense<0.000000e+00> : vector<8x128xf32>
    %63 = tpu.matmul %55, %62, %cst_25 {dimension_numbers = #tpu.dot_dimension_numbers<[1], [0], [0], [1], [0, 0, 1, 1], [], []>} : vector<8x32xf32>, vector<32x128xf32>, vector<8x128xf32> -> vector<8x128xf32>
    %64 = arith.addf %61, %63 : vector<8x128xf32>
    %65 = vector.extract_strided_slice %64 {offsets = [0, 0], sizes = [8, 96], strides = [1, 1]} : vector<8x128xf32> to vector<8x96xf32>
    %66 = arith.negf %65 : vector<8x96xf32>
    %67 = math.exp %66 : vector<8x96xf32>
    %cst_26 = arith.constant 1.000000e+00 : f32
    %68 = vector.broadcast %cst_26 : f32 to vector<8x96xf32>
    %69 = arith.addf %68, %67 : vector<8x96xf32>
    %70 = arith.divf %68, %69 : vector<8x96xf32>
    %71 = vector.extract_strided_slice %70 {offsets = [0, 0], sizes = [8, 32], strides = [1, 1]} : vector<8x96xf32> to vector<8x32xf32>
    %72 = vector.extract_strided_slice %70 {offsets = [0, 32], sizes = [8, 32], strides = [1, 1]} : vector<8x96xf32> to vector<8x32xf32>
    %73 = vector.extract_strided_slice %70 {offsets = [0, 64], sizes = [8, 32], strides = [1, 1]} : vector<8x96xf32> to vector<8x32xf32>
    %74 = vector.extract_strided_slice %64 {offsets = [0, 96], sizes = [8, 32], strides = [1, 1]} : vector<8x128xf32> to vector<8x32xf32>
    %75 = math.tanh %74 : vector<8x32xf32>
    %76 = arith.mulf %72, %53 : vector<8x32xf32>
    %77 = arith.mulf %71, %75 : vector<8x32xf32>
    %78 = arith.addf %76, %77 : vector<8x32xf32>
    %79 = math.tanh %78 : vector<8x32xf32>
    %80 = arith.mulf %73, %79 : vector<8x32xf32>
    %81 = arith.index_cast %59 : i32 to index
    %c0_27 = arith.constant 0 : index
    %82 = vector.load %arg11[%81, %c0_27] : memref<64x32xf32, #tpu.memory_space<vmem>>, vector<8x32xf32>
    tpu.vector_store %arg11[%81, %c0_27], %80 {strides = array<i32>} : memref<64x32xf32, #tpu.memory_space<vmem>>, vector<8x32xf32>,
    %c3_i32 = arith.constant 3 : i32
    %c8_i32_28 = arith.constant 8 : i32
    %83 = arith.muli %c3_i32, %c8_i32_28 : i32
    %84 = tpu.assume_multiple %83, 8 : i32
    %85 = arith.index_cast %84 : i32 to index
    %c0_29 = arith.constant 0 : index
    %86 = vector.load %arg10[%85, %c0_29] : memref<64x128xf32, #tpu.memory_space<vmem>>, vector<8x128xf32>
    %c0_30 = arith.constant 0 : index
    %c0_31 = arith.constant 0 : index
    %87 = vector.load %arg2[%c0_30, %c0_31] : memref<32x128xf32, #tpu.memory_space<vmem>>, vector<32x128xf32>
    %cst_32 = arith.constant dense<0.000000e+00> : vector<8x128xf32>
    %88 = tpu.matmul %80, %87, %cst_32 {dimension_numbers = #tpu.dot_dimension_numbers<[1], [0], [0], [1], [0, 0, 1, 1], [], []>} : vector<8x32xf32>, vector<32x128xf32>, vector<8x128xf32> -> vector<8x128xf32>
    %89 = arith.addf %86, %88 : vector<8x128xf32>
    %90 = vector.extract_strided_slice %89 {offsets = [0, 0], sizes = [8, 96], strides = [1, 1]} : vector<8x128xf32> to vector<8x96xf32>
    %91 = arith.negf %90 : vector<8x96xf32>
    %92 = math.exp %91 : vector<8x96xf32>
    %cst_33 = arith.constant 1.000000e+00 : f32
    %93 = vector.broadcast %cst_33 : f32 to vector<8x96xf32>
    %94 = arith.addf %93, %92 : vector<8x96xf32>
    %95 = arith.divf %93, %94 : vector<8x96xf32>
    %96 = vector.extract_strided_slice %95 {offsets = [0, 0], sizes = [8, 32], strides = [1, 1]} : vector<8x96xf32> to vector<8x32xf32>
    %97 = vector.extract_strided_slice %95 {offsets = [0, 32], sizes = [8, 32], strides = [1, 1]} : vector<8x96xf32> to vector<8x32xf32>
    %98 = vector.extract_strided_slice %95 {offsets = [0, 64], sizes = [8, 32], strides = [1, 1]} : vector<8x96xf32> to vector<8x32xf32>
    %99 = vector.extract_strided_slice %89 {offsets = [0, 96], sizes = [8, 32], strides = [1, 1]} : vector<8x128xf32> to vector<8x32xf32>
    %100 = math.tanh %99 : vector<8x32xf32>
    %101 = arith.mulf %97, %78 : vector<8x32xf32>
    %102 = arith.mulf %96, %100 : vector<8x32xf32>
    %103 = arith.addf %101, %102 : vector<8x32xf32>
    %104 = math.tanh %103 : vector<8x32xf32>
    %105 = arith.mulf %98, %104 : vector<8x32xf32>
    %106 = arith.index_cast %84 : i32 to index
    %c0_34 = arith.constant 0 : index
    %107 = vector.load %arg11[%106, %c0_34] : memref<64x32xf32, #tpu.memory_space<vmem>>, vector<8x32xf32>
    tpu.vector_store %arg11[%106, %c0_34], %105 {strides = array<i32>} : memref<64x32xf32, #tpu.memory_space<vmem>>, vector<8x32xf32>,
    %c4_i32 = arith.constant 4 : i32
    %c8_i32_35 = arith.constant 8 : i32
    %108 = arith.muli %c4_i32, %c8_i32_35 : i32
    %109 = tpu.assume_multiple %108, 8 : i32
    %110 = arith.index_cast %109 : i32 to index
    %c0_36 = arith.constant 0 : index
    %111 = vector.load %arg10[%110, %c0_36] : memref<64x128xf32, #tpu.memory_space<vmem>>, vector<8x128xf32>
    %c0_37 = arith.constant 0 : index
    %c0_38 = arith.constant 0 : index
    %112 = vector.load %arg2[%c0_37, %c0_38] : memref<32x128xf32, #tpu.memory_space<vmem>>, vector<32x128xf32>
    %cst_39 = arith.constant dense<0.000000e+00> : vector<8x128xf32>
    %113 = tpu.matmul %105, %112, %cst_39 {dimension_numbers = #tpu.dot_dimension_numbers<[1], [0], [0], [1], [0, 0, 1, 1], [], []>} : vector<8x32xf32>, vector<32x128xf32>, vector<8x128xf32> -> vector<8x128xf32>
    %114 = arith.addf %111, %113 : vector<8x128xf32>
    %115 = vector.extract_strided_slice %114 {offsets = [0, 0], sizes = [8, 96], strides = [1, 1]} : vector<8x128xf32> to vector<8x96xf32>
    %116 = arith.negf %115 : vector<8x96xf32>
    %117 = math.exp %116 : vector<8x96xf32>
    %cst_40 = arith.constant 1.000000e+00 : f32
    %118 = vector.broadcast %cst_40 : f32 to vector<8x96xf32>
    %119 = arith.addf %118, %117 : vector<8x96xf32>
    %120 = arith.divf %118, %119 : vector<8x96xf32>
    %121 = vector.extract_strided_slice %120 {offsets = [0, 0], sizes = [8, 32], strides = [1, 1]} : vector<8x96xf32> to vector<8x32xf32>
    %122 = vector.extract_strided_slice %120 {offsets = [0, 32], sizes = [8, 32], strides = [1, 1]} : vector<8x96xf32> to vector<8x32xf32>
    %123 = vector.extract_strided_slice %120 {offsets = [0, 64], sizes = [8, 32], strides = [1, 1]} : vector<8x96xf32> to vector<8x32xf32>
    %124 = vector.extract_strided_slice %114 {offsets = [0, 96], sizes = [8, 32], strides = [1, 1]} : vector<8x128xf32> to vector<8x32xf32>
    %125 = math.tanh %124 : vector<8x32xf32>
    %126 = arith.mulf %122, %103 : vector<8x32xf32>
    %127 = arith.mulf %121, %125 : vector<8x32xf32>
    %128 = arith.addf %126, %127 : vector<8x32xf32>
    %129 = math.tanh %128 : vector<8x32xf32>
    %130 = arith.mulf %123, %129 : vector<8x32xf32>
    %131 = arith.index_cast %109 : i32 to index
    %c0_41 = arith.constant 0 : index
    %132 = vector.load %arg11[%131, %c0_41] : memref<64x32xf32, #tpu.memory_space<vmem>>, vector<8x32xf32>
    tpu.vector_store %arg11[%131, %c0_41], %130 {strides = array<i32>} : memref<64x32xf32, #tpu.memory_space<vmem>>, vector<8x32xf32>,
    %c5_i32 = arith.constant 5 : i32
    %c8_i32_42 = arith.constant 8 : i32
    %133 = arith.muli %c5_i32, %c8_i32_42 : i32
    %134 = tpu.assume_multiple %133, 8 : i32
    %135 = arith.index_cast %134 : i32 to index
    %c0_43 = arith.constant 0 : index
    %136 = vector.load %arg10[%135, %c0_43] : memref<64x128xf32, #tpu.memory_space<vmem>>, vector<8x128xf32>
    %c0_44 = arith.constant 0 : index
    %c0_45 = arith.constant 0 : index
    %137 = vector.load %arg2[%c0_44, %c0_45] : memref<32x128xf32, #tpu.memory_space<vmem>>, vector<32x128xf32>
    %cst_46 = arith.constant dense<0.000000e+00> : vector<8x128xf32>
    %138 = tpu.matmul %130, %137, %cst_46 {dimension_numbers = #tpu.dot_dimension_numbers<[1], [0], [0], [1], [0, 0, 1, 1], [], []>} : vector<8x32xf32>, vector<32x128xf32>, vector<8x128xf32> -> vector<8x128xf32>
    %139 = arith.addf %136, %138 : vector<8x128xf32>
    %140 = vector.extract_strided_slice %139 {offsets = [0, 0], sizes = [8, 96], strides = [1, 1]} : vector<8x128xf32> to vector<8x96xf32>
    %141 = arith.negf %140 : vector<8x96xf32>
    %142 = math.exp %141 : vector<8x96xf32>
    %cst_47 = arith.constant 1.000000e+00 : f32
    %143 = vector.broadcast %cst_47 : f32 to vector<8x96xf32>
    %144 = arith.addf %143, %142 : vector<8x96xf32>
    %145 = arith.divf %143, %144 : vector<8x96xf32>
    %146 = vector.extract_strided_slice %145 {offsets = [0, 0], sizes = [8, 32], strides = [1, 1]} : vector<8x96xf32> to vector<8x32xf32>
    %147 = vector.extract_strided_slice %145 {offsets = [0, 32], sizes = [8, 32], strides = [1, 1]} : vector<8x96xf32> to vector<8x32xf32>
    %148 = vector.extract_strided_slice %145 {offsets = [0, 64], sizes = [8, 32], strides = [1, 1]} : vector<8x96xf32> to vector<8x32xf32>
    %149 = vector.extract_strided_slice %139 {offsets = [0, 96], sizes = [8, 32], strides = [1, 1]} : vector<8x128xf32> to vector<8x32xf32>
    %150 = math.tanh %149 : vector<8x32xf32>
    %151 = arith.mulf %147, %128 : vector<8x32xf32>
    %152 = arith.mulf %146, %150 : vector<8x32xf32>
    %153 = arith.addf %151, %152 : vector<8x32xf32>
    %154 = math.tanh %153 : vector<8x32xf32>
    %155 = arith.mulf %148, %154 : vector<8x32xf32>
    %156 = arith.index_cast %134 : i32 to index
    %c0_48 = arith.constant 0 : index
    %157 = vector.load %arg11[%156, %c0_48] : memref<64x32xf32, #tpu.memory_space<vmem>>, vector<8x32xf32>
    tpu.vector_store %arg11[%156, %c0_48], %155 {strides = array<i32>} : memref<64x32xf32, #tpu.memory_space<vmem>>, vector<8x32xf32>,
    %c6_i32 = arith.constant 6 : i32
    %c8_i32_49 = arith.constant 8 : i32
    %158 = arith.muli %c6_i32, %c8_i32_49 : i32
    %159 = tpu.assume_multiple %158, 8 : i32
    %160 = arith.index_cast %159 : i32 to index
    %c0_50 = arith.constant 0 : index
    %161 = vector.load %arg10[%160, %c0_50] : memref<64x128xf32, #tpu.memory_space<vmem>>, vector<8x128xf32>
    %c0_51 = arith.constant 0 : index
    %c0_52 = arith.constant 0 : index
    %162 = vector.load %arg2[%c0_51, %c0_52] : memref<32x128xf32, #tpu.memory_space<vmem>>, vector<32x128xf32>
    %cst_53 = arith.constant dense<0.000000e+00> : vector<8x128xf32>
    %163 = tpu.matmul %155, %162, %cst_53 {dimension_numbers = #tpu.dot_dimension_numbers<[1], [0], [0], [1], [0, 0, 1, 1], [], []>} : vector<8x32xf32>, vector<32x128xf32>, vector<8x128xf32> -> vector<8x128xf32>
    %164 = arith.addf %161, %163 : vector<8x128xf32>
    %165 = vector.extract_strided_slice %164 {offsets = [0, 0], sizes = [8, 96], strides = [1, 1]} : vector<8x128xf32> to vector<8x96xf32>
    %166 = arith.negf %165 : vector<8x96xf32>
    %167 = math.exp %166 : vector<8x96xf32>
    %cst_54 = arith.constant 1.000000e+00 : f32
    %168 = vector.broadcast %cst_54 : f32 to vector<8x96xf32>
    %169 = arith.addf %168, %167 : vector<8x96xf32>
    %170 = arith.divf %168, %169 : vector<8x96xf32>
    %171 = vector.extract_strided_slice %170 {offsets = [0, 0], sizes = [8, 32], strides = [1, 1]} : vector<8x96xf32> to vector<8x32xf32>
    %172 = vector.extract_strided_slice %170 {offsets = [0, 32], sizes = [8, 32], strides = [1, 1]} : vector<8x96xf32> to vector<8x32xf32>
    %173 = vector.extract_strided_slice %170 {offsets = [0, 64], sizes = [8, 32], strides = [1, 1]} : vector<8x96xf32> to vector<8x32xf32>
    %174 = vector.extract_strided_slice %164 {offsets = [0, 96], sizes = [8, 32], strides = [1, 1]} : vector<8x128xf32> to vector<8x32xf32>
    %175 = math.tanh %174 : vector<8x32xf32>
    %176 = arith.mulf %172, %153 : vector<8x32xf32>
    %177 = arith.mulf %171, %175 : vector<8x32xf32>
    %178 = arith.addf %176, %177 : vector<8x32xf32>
    %179 = math.tanh %178 : vector<8x32xf32>
    %180 = arith.mulf %173, %179 : vector<8x32xf32>
    %181 = arith.index_cast %159 : i32 to index
    %c0_55 = arith.constant 0 : index
    %182 = vector.load %arg11[%181, %c0_55] : memref<64x32xf32, #tpu.memory_space<vmem>>, vector<8x32xf32>
    tpu.vector_store %arg11[%181, %c0_55], %180 {strides = array<i32>} : memref<64x32xf32, #tpu.memory_space<vmem>>, vector<8x32xf32>,
    %c7_i32 = arith.constant 7 : i32
    %c8_i32_56 = arith.constant 8 : i32
    %183 = arith.muli %c7_i32, %c8_i32_56 : i32
    %184 = tpu.assume_multiple %183, 8 : i32
    %185 = arith.index_cast %184 : i32 to index
    %c0_57 = arith.constant 0 : index
    %186 = vector.load %arg10[%185, %c0_57] : memref<64x128xf32, #tpu.memory_space<vmem>>, vector<8x128xf32>
    %c0_58 = arith.constant 0 : index
    %c0_59 = arith.constant 0 : index
    %187 = vector.load %arg2[%c0_58, %c0_59] : memref<32x128xf32, #tpu.memory_space<vmem>>, vector<32x128xf32>
    %cst_60 = arith.constant dense<0.000000e+00> : vector<8x128xf32>
    %188 = tpu.matmul %180, %187, %cst_60 {dimension_numbers = #tpu.dot_dimension_numbers<[1], [0], [0], [1], [0, 0, 1, 1], [], []>} : vector<8x32xf32>, vector<32x128xf32>, vector<8x128xf32> -> vector<8x128xf32>
    %189 = arith.addf %186, %188 : vector<8x128xf32>
    %190 = vector.extract_strided_slice %189 {offsets = [0, 0], sizes = [8, 96], strides = [1, 1]} : vector<8x128xf32> to vector<8x96xf32>
    %191 = arith.negf %190 : vector<8x96xf32>
    %192 = math.exp %191 : vector<8x96xf32>
    %cst_61 = arith.constant 1.000000e+00 : f32
    %193 = vector.broadcast %cst_61 : f32 to vector<8x96xf32>
    %194 = arith.addf %193, %192 : vector<8x96xf32>
    %195 = arith.divf %193, %194 : vector<8x96xf32>
    %196 = vector.extract_strided_slice %195 {offsets = [0, 0], sizes = [8, 32], strides = [1, 1]} : vector<8x96xf32> to vector<8x32xf32>
    %197 = vector.extract_strided_slice %195 {offsets = [0, 32], sizes = [8, 32], strides = [1, 1]} : vector<8x96xf32> to vector<8x32xf32>
    %198 = vector.extract_strided_slice %195 {offsets = [0, 64], sizes = [8, 32], strides = [1, 1]} : vector<8x96xf32> to vector<8x32xf32>
    %199 = vector.extract_strided_slice %189 {offsets = [0, 96], sizes = [8, 32], strides = [1, 1]} : vector<8x128xf32> to vector<8x32xf32>
    %200 = math.tanh %199 : vector<8x32xf32>
    %201 = arith.mulf %197, %178 : vector<8x32xf32>
    %202 = arith.mulf %196, %200 : vector<8x32xf32>
    %203 = arith.addf %201, %202 : vector<8x32xf32>
    %204 = math.tanh %203 : vector<8x32xf32>
    %205 = arith.mulf %198, %204 : vector<8x32xf32>
    %206 = arith.index_cast %184 : i32 to index
    %c0_62 = arith.constant 0 : index
    %207 = vector.load %arg11[%206, %c0_62] : memref<64x32xf32, #tpu.memory_space<vmem>>, vector<8x32xf32>
    tpu.vector_store %arg11[%206, %c0_62], %205 {strides = array<i32>} : memref<64x32xf32, #tpu.memory_space<vmem>>, vector<8x32xf32>,
    %c8_i32_63 = arith.constant 8 : i32
    %c0_64 = arith.constant 0 : index
    %c0_65 = arith.constant 0 : index
    %208 = vector.load %arg11[%c0_64, %c0_65] : memref<64x32xf32, #tpu.memory_space<vmem>>, vector<64x32xf32>
    %c0_66 = arith.constant 0 : index
    %c0_67 = arith.constant 0 : index
    %209 = vector.load %arg4[%c0_66, %c0_67] : memref<32x128xf32, #tpu.memory_space<vmem>>, vector<32x128xf32>
    %cst_68 = arith.constant dense<0.000000e+00> : vector<64x128xf32>
    %210 = tpu.matmul %208, %209, %cst_68 {dimension_numbers = #tpu.dot_dimension_numbers<[1], [0], [0], [1], [0, 0, 1, 1], [], []>} : vector<64x32xf32>, vector<32x128xf32>, vector<64x128xf32> -> vector<64x128xf32>
    %c0_69 = arith.constant 0 : index
    %c0_70 = arith.constant 0 : index
    %211 = vector.load %arg6[%c0_69, %c0_70] : memref<1x128xf32, #tpu.memory_space<vmem>>, vector<1x128xf32>
    %212 = vector.broadcast %211 : vector<1x128xf32> to vector<64x128xf32>
    %213 = arith.addf %210, %212 : vector<64x128xf32>
    %c0_71 = arith.constant 0 : index
    %c0_72 = arith.constant 0 : index
    %214 = vector.load %arg10[%c0_71, %c0_72] : memref<64x128xf32, #tpu.memory_space<vmem>>, vector<64x128xf32>
    tpu.vector_store %arg10[%c0_71, %c0_72], %213 {strides = array<i32>} : memref<64x128xf32, #tpu.memory_space<vmem>>, vector<64x128xf32>,
    %c0_i32_73 = arith.constant 0 : i32
    %c8_i32_74 = arith.constant 8 : i32
    %215 = arith.muli %c0_i32_73, %c8_i32_74 : i32
    %216 = tpu.assume_multiple %215, 8 : i32
    %217 = arith.index_cast %216 : i32 to index
    %c0_75 = arith.constant 0 : index
    %218 = vector.load %arg10[%217, %c0_75] : memref<64x128xf32, #tpu.memory_space<vmem>>, vector<8x128xf32>
    %c0_76 = arith.constant 0 : index
    %c0_77 = arith.constant 0 : index
    %219 = vector.load %arg5[%c0_76, %c0_77] : memref<32x128xf32, #tpu.memory_space<vmem>>, vector<32x128xf32>
    %cst_78 = arith.constant dense<0.000000e+00> : vector<8x128xf32>
    %220 = tpu.matmul %0, %219, %cst_78 {dimension_numbers = #tpu.dot_dimension_numbers<[1], [0], [0], [1], [0, 0, 1, 1], [], []>} : vector<8x32xf32>, vector<32x128xf32>, vector<8x128xf32> -> vector<8x128xf32>
    %221 = arith.addf %218, %220 : vector<8x128xf32>
    %222 = vector.extract_strided_slice %221 {offsets = [0, 0], sizes = [8, 96], strides = [1, 1]} : vector<8x128xf32> to vector<8x96xf32>
    %223 = arith.negf %222 : vector<8x96xf32>
    %224 = math.exp %223 : vector<8x96xf32>
    %cst_79 = arith.constant 1.000000e+00 : f32
    %225 = vector.broadcast %cst_79 : f32 to vector<8x96xf32>
    %226 = arith.addf %225, %224 : vector<8x96xf32>
    %227 = arith.divf %225, %226 : vector<8x96xf32>
    %228 = vector.extract_strided_slice %227 {offsets = [0, 0], sizes = [8, 32], strides = [1, 1]} : vector<8x96xf32> to vector<8x32xf32>
    %229 = vector.extract_strided_slice %227 {offsets = [0, 32], sizes = [8, 32], strides = [1, 1]} : vector<8x96xf32> to vector<8x32xf32>
    %230 = vector.extract_strided_slice %227 {offsets = [0, 64], sizes = [8, 32], strides = [1, 1]} : vector<8x96xf32> to vector<8x32xf32>
    %231 = vector.extract_strided_slice %221 {offsets = [0, 96], sizes = [8, 32], strides = [1, 1]} : vector<8x128xf32> to vector<8x32xf32>
    %232 = math.tanh %231 : vector<8x32xf32>
    %233 = arith.mulf %229, %0 : vector<8x32xf32>
    %234 = arith.mulf %228, %232 : vector<8x32xf32>
    %235 = arith.addf %233, %234 : vector<8x32xf32>
    %236 = math.tanh %235 : vector<8x32xf32>
    %237 = arith.mulf %230, %236 : vector<8x32xf32>
    %238 = arith.index_cast %216 : i32 to index
    %c0_80 = arith.constant 0 : index
    %239 = vector.load %arg11[%238, %c0_80] : memref<64x32xf32, #tpu.memory_space<vmem>>, vector<8x32xf32>
    tpu.vector_store %arg11[%238, %c0_80], %237 {strides = array<i32>} : memref<64x32xf32, #tpu.memory_space<vmem>>, vector<8x32xf32>,
    %c1_i32_81 = arith.constant 1 : i32
    %c8_i32_82 = arith.constant 8 : i32
    %240 = arith.muli %c1_i32_81, %c8_i32_82 : i32
    %241 = tpu.assume_multiple %240, 8 : i32
    %242 = arith.index_cast %241 : i32 to index
    %c0_83 = arith.constant 0 : index
    %243 = vector.load %arg10[%242, %c0_83] : memref<64x128xf32, #tpu.memory_space<vmem>>, vector<8x128xf32>
    %c0_84 = arith.constant 0 : index
    %c0_85 = arith.constant 0 : index
    %244 = vector.load %arg5[%c0_84, %c0_85] : memref<32x128xf32, #tpu.memory_space<vmem>>, vector<32x128xf32>
    %cst_86 = arith.constant dense<0.000000e+00> : vector<8x128xf32>
    %245 = tpu.matmul %237, %244, %cst_86 {dimension_numbers = #tpu.dot_dimension_numbers<[1], [0], [0], [1], [0, 0, 1, 1], [], []>} : vector<8x32xf32>, vector<32x128xf32>, vector<8x128xf32> -> vector<8x128xf32>
    %246 = arith.addf %243, %245 : vector<8x128xf32>
    %247 = vector.extract_strided_slice %246 {offsets = [0, 0], sizes = [8, 96], strides = [1, 1]} : vector<8x128xf32> to vector<8x96xf32>
    %248 = arith.negf %247 : vector<8x96xf32>
    %249 = math.exp %248 : vector<8x96xf32>
    %cst_87 = arith.constant 1.000000e+00 : f32
    %250 = vector.broadcast %cst_87 : f32 to vector<8x96xf32>
    %251 = arith.addf %250, %249 : vector<8x96xf32>
    %252 = arith.divf %250, %251 : vector<8x96xf32>
    %253 = vector.extract_strided_slice %252 {offsets = [0, 0], sizes = [8, 32], strides = [1, 1]} : vector<8x96xf32> to vector<8x32xf32>
    %254 = vector.extract_strided_slice %252 {offsets = [0, 32], sizes = [8, 32], strides = [1, 1]} : vector<8x96xf32> to vector<8x32xf32>
    %255 = vector.extract_strided_slice %252 {offsets = [0, 64], sizes = [8, 32], strides = [1, 1]} : vector<8x96xf32> to vector<8x32xf32>
    %256 = vector.extract_strided_slice %246 {offsets = [0, 96], sizes = [8, 32], strides = [1, 1]} : vector<8x128xf32> to vector<8x32xf32>
    %257 = math.tanh %256 : vector<8x32xf32>
    %258 = arith.mulf %254, %235 : vector<8x32xf32>
    %259 = arith.mulf %253, %257 : vector<8x32xf32>
    %260 = arith.addf %258, %259 : vector<8x32xf32>
    %261 = math.tanh %260 : vector<8x32xf32>
    %262 = arith.mulf %255, %261 : vector<8x32xf32>
    %263 = arith.index_cast %241 : i32 to index
    %c0_88 = arith.constant 0 : index
    %264 = vector.load %arg11[%263, %c0_88] : memref<64x32xf32, #tpu.memory_space<vmem>>, vector<8x32xf32>
    tpu.vector_store %arg11[%263, %c0_88], %262 {strides = array<i32>} : memref<64x32xf32, #tpu.memory_space<vmem>>, vector<8x32xf32>,
    %c2_i32_89 = arith.constant 2 : i32
    %c8_i32_90 = arith.constant 8 : i32
    %265 = arith.muli %c2_i32_89, %c8_i32_90 : i32
    %266 = tpu.assume_multiple %265, 8 : i32
    %267 = arith.index_cast %266 : i32 to index
    %c0_91 = arith.constant 0 : index
    %268 = vector.load %arg10[%267, %c0_91] : memref<64x128xf32, #tpu.memory_space<vmem>>, vector<8x128xf32>
    %c0_92 = arith.constant 0 : index
    %c0_93 = arith.constant 0 : index
    %269 = vector.load %arg5[%c0_92, %c0_93] : memref<32x128xf32, #tpu.memory_space<vmem>>, vector<32x128xf32>
    %cst_94 = arith.constant dense<0.000000e+00> : vector<8x128xf32>
    %270 = tpu.matmul %262, %269, %cst_94 {dimension_numbers = #tpu.dot_dimension_numbers<[1], [0], [0], [1], [0, 0, 1, 1], [], []>} : vector<8x32xf32>, vector<32x128xf32>, vector<8x128xf32> -> vector<8x128xf32>
    %271 = arith.addf %268, %270 : vector<8x128xf32>
    %272 = vector.extract_strided_slice %271 {offsets = [0, 0], sizes = [8, 96], strides = [1, 1]} : vector<8x128xf32> to vector<8x96xf32>
    %273 = arith.negf %272 : vector<8x96xf32>
    %274 = math.exp %273 : vector<8x96xf32>
    %cst_95 = arith.constant 1.000000e+00 : f32
    %275 = vector.broadcast %cst_95 : f32 to vector<8x96xf32>
    %276 = arith.addf %275, %274 : vector<8x96xf32>
    %277 = arith.divf %275, %276 : vector<8x96xf32>
    %278 = vector.extract_strided_slice %277 {offsets = [0, 0], sizes = [8, 32], strides = [1, 1]} : vector<8x96xf32> to vector<8x32xf32>
    %279 = vector.extract_strided_slice %277 {offsets = [0, 32], sizes = [8, 32], strides = [1, 1]} : vector<8x96xf32> to vector<8x32xf32>
    %280 = vector.extract_strided_slice %277 {offsets = [0, 64], sizes = [8, 32], strides = [1, 1]} : vector<8x96xf32> to vector<8x32xf32>
    %281 = vector.extract_strided_slice %271 {offsets = [0, 96], sizes = [8, 32], strides = [1, 1]} : vector<8x128xf32> to vector<8x32xf32>
    %282 = math.tanh %281 : vector<8x32xf32>
    %283 = arith.mulf %279, %260 : vector<8x32xf32>
    %284 = arith.mulf %278, %282 : vector<8x32xf32>
    %285 = arith.addf %283, %284 : vector<8x32xf32>
    %286 = math.tanh %285 : vector<8x32xf32>
    %287 = arith.mulf %280, %286 : vector<8x32xf32>
    %288 = arith.index_cast %266 : i32 to index
    %c0_96 = arith.constant 0 : index
    %289 = vector.load %arg11[%288, %c0_96] : memref<64x32xf32, #tpu.memory_space<vmem>>, vector<8x32xf32>
    tpu.vector_store %arg11[%288, %c0_96], %287 {strides = array<i32>} : memref<64x32xf32, #tpu.memory_space<vmem>>, vector<8x32xf32>,
    %c3_i32_97 = arith.constant 3 : i32
    %c8_i32_98 = arith.constant 8 : i32
    %290 = arith.muli %c3_i32_97, %c8_i32_98 : i32
    %291 = tpu.assume_multiple %290, 8 : i32
    %292 = arith.index_cast %291 : i32 to index
    %c0_99 = arith.constant 0 : index
    %293 = vector.load %arg10[%292, %c0_99] : memref<64x128xf32, #tpu.memory_space<vmem>>, vector<8x128xf32>
    %c0_100 = arith.constant 0 : index
    %c0_101 = arith.constant 0 : index
    %294 = vector.load %arg5[%c0_100, %c0_101] : memref<32x128xf32, #tpu.memory_space<vmem>>, vector<32x128xf32>
    %cst_102 = arith.constant dense<0.000000e+00> : vector<8x128xf32>
    %295 = tpu.matmul %287, %294, %cst_102 {dimension_numbers = #tpu.dot_dimension_numbers<[1], [0], [0], [1], [0, 0, 1, 1], [], []>} : vector<8x32xf32>, vector<32x128xf32>, vector<8x128xf32> -> vector<8x128xf32>
    %296 = arith.addf %293, %295 : vector<8x128xf32>
    %297 = vector.extract_strided_slice %296 {offsets = [0, 0], sizes = [8, 96], strides = [1, 1]} : vector<8x128xf32> to vector<8x96xf32>
    %298 = arith.negf %297 : vector<8x96xf32>
    %299 = math.exp %298 : vector<8x96xf32>
    %cst_103 = arith.constant 1.000000e+00 : f32
    %300 = vector.broadcast %cst_103 : f32 to vector<8x96xf32>
    %301 = arith.addf %300, %299 : vector<8x96xf32>
    %302 = arith.divf %300, %301 : vector<8x96xf32>
    %303 = vector.extract_strided_slice %302 {offsets = [0, 0], sizes = [8, 32], strides = [1, 1]} : vector<8x96xf32> to vector<8x32xf32>
    %304 = vector.extract_strided_slice %302 {offsets = [0, 32], sizes = [8, 32], strides = [1, 1]} : vector<8x96xf32> to vector<8x32xf32>
    %305 = vector.extract_strided_slice %302 {offsets = [0, 64], sizes = [8, 32], strides = [1, 1]} : vector<8x96xf32> to vector<8x32xf32>
    %306 = vector.extract_strided_slice %296 {offsets = [0, 96], sizes = [8, 32], strides = [1, 1]} : vector<8x128xf32> to vector<8x32xf32>
    %307 = math.tanh %306 : vector<8x32xf32>
    %308 = arith.mulf %304, %285 : vector<8x32xf32>
    %309 = arith.mulf %303, %307 : vector<8x32xf32>
    %310 = arith.addf %308, %309 : vector<8x32xf32>
    %311 = math.tanh %310 : vector<8x32xf32>
    %312 = arith.mulf %305, %311 : vector<8x32xf32>
    %313 = arith.index_cast %291 : i32 to index
    %c0_104 = arith.constant 0 : index
    %314 = vector.load %arg11[%313, %c0_104] : memref<64x32xf32, #tpu.memory_space<vmem>>, vector<8x32xf32>
    tpu.vector_store %arg11[%313, %c0_104], %312 {strides = array<i32>} : memref<64x32xf32, #tpu.memory_space<vmem>>, vector<8x32xf32>,
    %c4_i32_105 = arith.constant 4 : i32
    %c8_i32_106 = arith.constant 8 : i32
    %315 = arith.muli %c4_i32_105, %c8_i32_106 : i32
    %316 = tpu.assume_multiple %315, 8 : i32
    %317 = arith.index_cast %316 : i32 to index
    %c0_107 = arith.constant 0 : index
    %318 = vector.load %arg10[%317, %c0_107] : memref<64x128xf32, #tpu.memory_space<vmem>>, vector<8x128xf32>
    %c0_108 = arith.constant 0 : index
    %c0_109 = arith.constant 0 : index
    %319 = vector.load %arg5[%c0_108, %c0_109] : memref<32x128xf32, #tpu.memory_space<vmem>>, vector<32x128xf32>
    %cst_110 = arith.constant dense<0.000000e+00> : vector<8x128xf32>
    %320 = tpu.matmul %312, %319, %cst_110 {dimension_numbers = #tpu.dot_dimension_numbers<[1], [0], [0], [1], [0, 0, 1, 1], [], []>} : vector<8x32xf32>, vector<32x128xf32>, vector<8x128xf32> -> vector<8x128xf32>
    %321 = arith.addf %318, %320 : vector<8x128xf32>
    %322 = vector.extract_strided_slice %321 {offsets = [0, 0], sizes = [8, 96], strides = [1, 1]} : vector<8x128xf32> to vector<8x96xf32>
    %323 = arith.negf %322 : vector<8x96xf32>
    %324 = math.exp %323 : vector<8x96xf32>
    %cst_111 = arith.constant 1.000000e+00 : f32
    %325 = vector.broadcast %cst_111 : f32 to vector<8x96xf32>
    %326 = arith.addf %325, %324 : vector<8x96xf32>
    %327 = arith.divf %325, %326 : vector<8x96xf32>
    %328 = vector.extract_strided_slice %327 {offsets = [0, 0], sizes = [8, 32], strides = [1, 1]} : vector<8x96xf32> to vector<8x32xf32>
    %329 = vector.extract_strided_slice %327 {offsets = [0, 32], sizes = [8, 32], strides = [1, 1]} : vector<8x96xf32> to vector<8x32xf32>
    %330 = vector.extract_strided_slice %327 {offsets = [0, 64], sizes = [8, 32], strides = [1, 1]} : vector<8x96xf32> to vector<8x32xf32>
    %331 = vector.extract_strided_slice %321 {offsets = [0, 96], sizes = [8, 32], strides = [1, 1]} : vector<8x128xf32> to vector<8x32xf32>
    %332 = math.tanh %331 : vector<8x32xf32>
    %333 = arith.mulf %329, %310 : vector<8x32xf32>
    %334 = arith.mulf %328, %332 : vector<8x32xf32>
    %335 = arith.addf %333, %334 : vector<8x32xf32>
    %336 = math.tanh %335 : vector<8x32xf32>
    %337 = arith.mulf %330, %336 : vector<8x32xf32>
    %338 = arith.index_cast %316 : i32 to index
    %c0_112 = arith.constant 0 : index
    %339 = vector.load %arg11[%338, %c0_112] : memref<64x32xf32, #tpu.memory_space<vmem>>, vector<8x32xf32>
    tpu.vector_store %arg11[%338, %c0_112], %337 {strides = array<i32>} : memref<64x32xf32, #tpu.memory_space<vmem>>, vector<8x32xf32>,
    %c5_i32_113 = arith.constant 5 : i32
    %c8_i32_114 = arith.constant 8 : i32
    %340 = arith.muli %c5_i32_113, %c8_i32_114 : i32
    %341 = tpu.assume_multiple %340, 8 : i32
    %342 = arith.index_cast %341 : i32 to index
    %c0_115 = arith.constant 0 : index
    %343 = vector.load %arg10[%342, %c0_115] : memref<64x128xf32, #tpu.memory_space<vmem>>, vector<8x128xf32>
    %c0_116 = arith.constant 0 : index
    %c0_117 = arith.constant 0 : index
    %344 = vector.load %arg5[%c0_116, %c0_117] : memref<32x128xf32, #tpu.memory_space<vmem>>, vector<32x128xf32>
    %cst_118 = arith.constant dense<0.000000e+00> : vector<8x128xf32>
    %345 = tpu.matmul %337, %344, %cst_118 {dimension_numbers = #tpu.dot_dimension_numbers<[1], [0], [0], [1], [0, 0, 1, 1], [], []>} : vector<8x32xf32>, vector<32x128xf32>, vector<8x128xf32> -> vector<8x128xf32>
    %346 = arith.addf %343, %345 : vector<8x128xf32>
    %347 = vector.extract_strided_slice %346 {offsets = [0, 0], sizes = [8, 96], strides = [1, 1]} : vector<8x128xf32> to vector<8x96xf32>
    %348 = arith.negf %347 : vector<8x96xf32>
    %349 = math.exp %348 : vector<8x96xf32>
    %cst_119 = arith.constant 1.000000e+00 : f32
    %350 = vector.broadcast %cst_119 : f32 to vector<8x96xf32>
    %351 = arith.addf %350, %349 : vector<8x96xf32>
    %352 = arith.divf %350, %351 : vector<8x96xf32>
    %353 = vector.extract_strided_slice %352 {offsets = [0, 0], sizes = [8, 32], strides = [1, 1]} : vector<8x96xf32> to vector<8x32xf32>
    %354 = vector.extract_strided_slice %352 {offsets = [0, 32], sizes = [8, 32], strides = [1, 1]} : vector<8x96xf32> to vector<8x32xf32>
    %355 = vector.extract_strided_slice %352 {offsets = [0, 64], sizes = [8, 32], strides = [1, 1]} : vector<8x96xf32> to vector<8x32xf32>
    %356 = vector.extract_strided_slice %346 {offsets = [0, 96], sizes = [8, 32], strides = [1, 1]} : vector<8x128xf32> to vector<8x32xf32>
    %357 = math.tanh %356 : vector<8x32xf32>
    %358 = arith.mulf %354, %335 : vector<8x32xf32>
    %359 = arith.mulf %353, %357 : vector<8x32xf32>
    %360 = arith.addf %358, %359 : vector<8x32xf32>
    %361 = math.tanh %360 : vector<8x32xf32>
    %362 = arith.mulf %355, %361 : vector<8x32xf32>
    %363 = arith.index_cast %341 : i32 to index
    %c0_120 = arith.constant 0 : index
    %364 = vector.load %arg11[%363, %c0_120] : memref<64x32xf32, #tpu.memory_space<vmem>>, vector<8x32xf32>
    tpu.vector_store %arg11[%363, %c0_120], %362 {strides = array<i32>} : memref<64x32xf32, #tpu.memory_space<vmem>>, vector<8x32xf32>,
    %c6_i32_121 = arith.constant 6 : i32
    %c8_i32_122 = arith.constant 8 : i32
    %365 = arith.muli %c6_i32_121, %c8_i32_122 : i32
    %366 = tpu.assume_multiple %365, 8 : i32
    %367 = arith.index_cast %366 : i32 to index
    %c0_123 = arith.constant 0 : index
    %368 = vector.load %arg10[%367, %c0_123] : memref<64x128xf32, #tpu.memory_space<vmem>>, vector<8x128xf32>
    %c0_124 = arith.constant 0 : index
    %c0_125 = arith.constant 0 : index
    %369 = vector.load %arg5[%c0_124, %c0_125] : memref<32x128xf32, #tpu.memory_space<vmem>>, vector<32x128xf32>
    %cst_126 = arith.constant dense<0.000000e+00> : vector<8x128xf32>
    %370 = tpu.matmul %362, %369, %cst_126 {dimension_numbers = #tpu.dot_dimension_numbers<[1], [0], [0], [1], [0, 0, 1, 1], [], []>} : vector<8x32xf32>, vector<32x128xf32>, vector<8x128xf32> -> vector<8x128xf32>
    %371 = arith.addf %368, %370 : vector<8x128xf32>
    %372 = vector.extract_strided_slice %371 {offsets = [0, 0], sizes = [8, 96], strides = [1, 1]} : vector<8x128xf32> to vector<8x96xf32>
    %373 = arith.negf %372 : vector<8x96xf32>
    %374 = math.exp %373 : vector<8x96xf32>
    %cst_127 = arith.constant 1.000000e+00 : f32
    %375 = vector.broadcast %cst_127 : f32 to vector<8x96xf32>
    %376 = arith.addf %375, %374 : vector<8x96xf32>
    %377 = arith.divf %375, %376 : vector<8x96xf32>
    %378 = vector.extract_strided_slice %377 {offsets = [0, 0], sizes = [8, 32], strides = [1, 1]} : vector<8x96xf32> to vector<8x32xf32>
    %379 = vector.extract_strided_slice %377 {offsets = [0, 32], sizes = [8, 32], strides = [1, 1]} : vector<8x96xf32> to vector<8x32xf32>
    %380 = vector.extract_strided_slice %377 {offsets = [0, 64], sizes = [8, 32], strides = [1, 1]} : vector<8x96xf32> to vector<8x32xf32>
    %381 = vector.extract_strided_slice %371 {offsets = [0, 96], sizes = [8, 32], strides = [1, 1]} : vector<8x128xf32> to vector<8x32xf32>
    %382 = math.tanh %381 : vector<8x32xf32>
    %383 = arith.mulf %379, %360 : vector<8x32xf32>
    %384 = arith.mulf %378, %382 : vector<8x32xf32>
    %385 = arith.addf %383, %384 : vector<8x32xf32>
    %386 = math.tanh %385 : vector<8x32xf32>
    %387 = arith.mulf %380, %386 : vector<8x32xf32>
    %388 = arith.index_cast %366 : i32 to index
    %c0_128 = arith.constant 0 : index
    %389 = vector.load %arg11[%388, %c0_128] : memref<64x32xf32, #tpu.memory_space<vmem>>, vector<8x32xf32>
    tpu.vector_store %arg11[%388, %c0_128], %387 {strides = array<i32>} : memref<64x32xf32, #tpu.memory_space<vmem>>, vector<8x32xf32>,
    %c7_i32_129 = arith.constant 7 : i32
    %c8_i32_130 = arith.constant 8 : i32
    %390 = arith.muli %c7_i32_129, %c8_i32_130 : i32
    %391 = tpu.assume_multiple %390, 8 : i32
    %392 = arith.index_cast %391 : i32 to index
    %c0_131 = arith.constant 0 : index
    %393 = vector.load %arg10[%392, %c0_131] : memref<64x128xf32, #tpu.memory_space<vmem>>, vector<8x128xf32>
    %c0_132 = arith.constant 0 : index
    %c0_133 = arith.constant 0 : index
    %394 = vector.load %arg5[%c0_132, %c0_133] : memref<32x128xf32, #tpu.memory_space<vmem>>, vector<32x128xf32>
    %cst_134 = arith.constant dense<0.000000e+00> : vector<8x128xf32>
    %395 = tpu.matmul %387, %394, %cst_134 {dimension_numbers = #tpu.dot_dimension_numbers<[1], [0], [0], [1], [0, 0, 1, 1], [], []>} : vector<8x32xf32>, vector<32x128xf32>, vector<8x128xf32> -> vector<8x128xf32>
    %396 = arith.addf %393, %395 : vector<8x128xf32>
    %397 = vector.extract_strided_slice %396 {offsets = [0, 0], sizes = [8, 96], strides = [1, 1]} : vector<8x128xf32> to vector<8x96xf32>
    %398 = arith.negf %397 : vector<8x96xf32>
    %399 = math.exp %398 : vector<8x96xf32>
    %cst_135 = arith.constant 1.000000e+00 : f32
    %400 = vector.broadcast %cst_135 : f32 to vector<8x96xf32>
    %401 = arith.addf %400, %399 : vector<8x96xf32>
    %402 = arith.divf %400, %401 : vector<8x96xf32>
    %403 = vector.extract_strided_slice %402 {offsets = [0, 0], sizes = [8, 32], strides = [1, 1]} : vector<8x96xf32> to vector<8x32xf32>
    %404 = vector.extract_strided_slice %402 {offsets = [0, 32], sizes = [8, 32], strides = [1, 1]} : vector<8x96xf32> to vector<8x32xf32>
    %405 = vector.extract_strided_slice %402 {offsets = [0, 64], sizes = [8, 32], strides = [1, 1]} : vector<8x96xf32> to vector<8x32xf32>
    %406 = vector.extract_strided_slice %396 {offsets = [0, 96], sizes = [8, 32], strides = [1, 1]} : vector<8x128xf32> to vector<8x32xf32>
    %407 = math.tanh %406 : vector<8x32xf32>
    %408 = arith.mulf %404, %385 : vector<8x32xf32>
    %409 = arith.mulf %403, %407 : vector<8x32xf32>
    %410 = arith.addf %408, %409 : vector<8x32xf32>
    %411 = math.tanh %410 : vector<8x32xf32>
    %412 = arith.mulf %405, %411 : vector<8x32xf32>
    %413 = arith.index_cast %391 : i32 to index
    %c0_136 = arith.constant 0 : index
    %414 = vector.load %arg11[%413, %c0_136] : memref<64x32xf32, #tpu.memory_space<vmem>>, vector<8x32xf32>
    tpu.vector_store %arg11[%413, %c0_136], %412 {strides = array<i32>} : memref<64x32xf32, #tpu.memory_space<vmem>>, vector<8x32xf32>,
    %c8_i32_137 = arith.constant 8 : i32
    %c0_138 = arith.constant 0 : index
    %c0_139 = arith.constant 0 : index
    %415 = vector.load %arg7[%c0_138, %c0_139] : memref<32x128xf32, #tpu.memory_space<vmem>>, vector<32x128xf32>
    %cst_140 = arith.constant dense<0.000000e+00> : vector<8x128xf32>
    %416 = tpu.matmul %412, %415, %cst_140 {dimension_numbers = #tpu.dot_dimension_numbers<[1], [0], [0], [1], [0, 0, 1, 1], [], []>} : vector<8x32xf32>, vector<32x128xf32>, vector<8x128xf32> -> vector<8x128xf32>
    %c0_141 = arith.constant 0 : index
    %c0_142 = arith.constant 0 : index
    %417 = vector.load %arg8[%c0_141, %c0_142] : memref<1x128xf32, #tpu.memory_space<vmem>>, vector<1x128xf32>
    %418 = vector.broadcast %417 : vector<1x128xf32> to vector<8x128xf32>
    %419 = arith.addf %416, %418 : vector<8x128xf32>
    %c0_143 = arith.constant 0 : index
    %c0_144 = arith.constant 0 : index
    %420 = vector.load %arg9[%c0_143, %c0_144] : memref<8x128xf32, #tpu.memory_space<vmem>>, vector<8x128xf32>
    tpu.vector_store %arg9[%c0_143, %c0_144], %419 {strides = array<i32>} : memref<8x128xf32, #tpu.memory_space<vmem>>, vector<8x128xf32>,
    return
  }
}

</mosaic_0001>

<bundles_post_ra>
// kernel: lstm_classifier_forward.1
= control target key start
LH: loop header
LB: loop body
LE: loop exit
PB: predicated region body
PF: predicated region fallthrough
CT: control target
= control target key end

     0   :  { %vm48_vm0 = vcmask 64512   ;;  %v2776_v0 = vmov 0.0|0.0   ;;  %vm2777_vm1 = vmmov 0   ;;  %v2778_v4 = vmov 0.0   ;;  %s2779_s23 = smov 32   ;;  %s3196_s2 = inlined_call_operand.vmem [shape: f32[32,128], index: 2, kind: input, shape index: {}]   ;;  %s3197_s1 = inlined_call_operand.vmem [shape: f32[8,128], index: 1, kind: input, shape index: {}]   ;;  %s3198_s0 = inlined_call_operand.vmem [shape: f32[64,8], index: 0, kind: input, shape index: {}]   ;;  %s3199_s3 = inlined_call_operand.vmem [shape: f32[1,128], index: 3, kind: input, shape index: {}]   ;;  %s3200_s4 = inlined_call_operand.vmem [shape: f32[32,128], index: 4, kind: input, shape index: {}]   ;;  %s3201_s5 = inlined_call_operand.vmem [shape: f32[32,128], index: 5, kind: input, shape index: {}]   ;;  %s3202_s6 = inlined_call_operand.vmem [shape: f32[1,128], index: 6, kind: input, shape index: {}]   ;;  %s3203_s7 = inlined_call_operand.vmem [shape: f32[32,128], index: 7, kind: input, shape index: {}]   ;;  %s3204_s8 = inlined_call_operand.vmem [shape: f32[1,128], index: 8, kind: input, shape index: {}]   ;;  %s3205_s9 = inlined_call_operand.vmem [shape: f32[8,128], index: 9, kind: output, shape index: {}]  }
   0x1   :  { %2533 = vmatprep.subr.bf16.mxu1 %v2776_v0  ;;  %v187_v1 = vld [vmem:[%s3196_s2] sm:$0xff]  ;;  %v188_v2 = vld [vmem:[%s3196_s2 + $0x8] sm:$0xff]  ;;  %2334 = vmatprep.mubr.msk.f32.mxu1 %vm2777_vm1, %v2778_v4  ;;  %v189_v8 = vld [vmem:[%s3196_s2 + $0x10] sm:$0xff]  ;;  %vm191_vm2 = vcmask 261120  }
   0x2   :  { %v40_v3 = vld [vmem:[%s3197_s1] sm:$0xff]  ;;  %v2843_v5 = vpack.c.bf16 %v188_v2, %v187_v1  ;;  %v33_v7 = vld [vmem:[%s3198_s0 + $0x8] sm:$0xff]  ;;  %v190_v9 = vld [vmem:[%s3196_s2 + $0x18] sm:$0xff] }
   0x3   :  { %2312 = vmatprep.subr.mxu0 %v40_v3  ;;  %v32_v6 = vld [vmem:[%s3198_s0] sm:$0xff]  ;;  %v2860_v10 = vpack.c.bf16 %v190_v9, %v189_v8  ;;  %v34_v46 = vld [vmem:[%s3198_s0 + $0x10] sm:$0xff]  ;;  %v35_v47 = vld [vmem:[%s3198_s0 + $0x18] sm:$0xff] }
   0x4   :  { %2313 = vmatpush3.msra.mxu0 %v40_v3  ;;  %2314 = vmatprep.mubr.msk.f32.mxu0 %vm48_vm0, %v32_v6  ;;  %v2880_v12 = vld [vmem:[%s3199_s3] ss:$0 sm:$0xff]  ;;  %s2780_s3 = smov 64   ;;  %v37_v49 = vld [vmem:[%s3198_s0 + $0x28] sm:$0xff]  ;;  %v38_v50 = vld [vmem:[%s3198_s0 + $0x30] sm:$0xff] }
   0x5   :  { %2535 = vmatpush3.bf16.msra.mxu1 %v2843_v5  ;;  %2315 = vmatmul.mubr.msk.f32.vlgmr.msra.gmra.mrb[0].mxu0 %vm48_vm0, %v33_v7  ;;  %v36_v48 = vld [vmem:[%s3198_s0 + $0x20] sm:$0xff]  ;;  %v39_v51 = vld [vmem:[%s3198_s0 + $0x38] sm:$0xff] }
   0x6   :  { %2536 = vmatprep.subr.bf16.mxu1 %v2776_v0  ;;  %2545 = vmatprep.subr.bf16.mxu0 %v2776_v0 }
   0x7   :  { %2547 = vmatpush3.bf16.msra.mxu0 %v2843_v5  ;;  %2317 = vmatprep.mubr.msk.f32.mxu0 %vm48_vm0, %v34_v46 }
   0x8   :  { %2548 = vmatprep.subr.bf16.mxu0 %v2776_v0 }
   0x9   :  { %2538 = vmatpush3.bf16.msra.mxu1 %v2860_v10  ;;  %2318 = vmatmul.mubr.msk.f32.gmra.mrb[2].mxu0 %vm48_vm0, %v35_v47 }
   0xa   :  { %2539 = vmatprep.subr.bf16.mxu1 %v2776_v0  ;;  %2320 = vmatprep.mubr.msk.f32.mxu0 %vm48_vm0, %v36_v48 }
   0xb   :  { %2550 = vmatpush3.bf16.msra.mxu0 %v2860_v10 }
   0xc   :  { %2335 = vmatmul.mubr.f32.vlgmr.msra.gmra.mrb[0].mxu1 %v2778_v4  ;;  %2557 = vmatprep.subr.bf16.mxu0 %v2776_v0 }
   0xd   :  { %2541 = vmatpush3.bf16.msra.mxu1 %v2843_v5  ;;  %2345 = vmatprep.mubr.msk.f32.mxu1 %vm2777_vm1, %v2778_v4 }
   0xe   :  { %2542 = vmatprep.subr.bf16.mxu1 %v2776_v0  ;;  %2321 = vmatmul.mubr.msk.f32.gmra.mrb[4].mxu0 %vm48_vm0, %v37_v49 }
   0xf   :  { %2323 = vmatprep.mubr.msk.f32.mxu0 %vm48_vm0, %v38_v50 }
  0x11   :  { %2544 = vmatpush3.bf16.msra.mxu1 %v2860_v10 }
  0x12   :  { %2551 = vmatprep.subr.bf16.mxu1 %v2776_v0  ;;  %2324 = vmatmul.mubr.msk.f32.gmra.mrb[6].mxu0 %vm48_vm0, %v39_v51 }
  0x13   :  { %2356 = vmatprep.mubr.msk.f32.mxu0 %vm2777_vm1, %v2778_v4 }
  0xd8   :  { %v2316_v11 = vpop.f32.mrb[0].mxu0 }
  0xd9   :  { %v139_v13 = vpop.f32.mrb[1].mxu0  ;;  %v145_v32 = vadd.f32 %v2316_v11, %v2880_v12 }
  0xda   :  { %v140_v14 = vadd.f32 %v2880_v12, %v139_v13 }
  0xdc   :  { %v2319_v55 = vpop.f32.mrb[2].mxu0 }
  0xdd   :  { %v149_v56 = vpop.f32.mrb[3].mxu0 }
  0xde   :  { %v150_v62 = vadd.f32 %v2880_v12, %v149_v56 }
  0xdf   :  { %v261_v15 = vpop.f32.mrb[0].mxu1 }
  0xe0   :  { %v265_v16 = vadd.f32 %v261_v15, %v140_v14  ;;  %v2336_v17 = vpop.f32.mrb[1].mxu1 }
  0xe1   :  { %v2926_v57 = vpop.f32.mrb[4].mxu0 }
  0xe2   :  { %2648 = vtanh.f32 %v265_v16  ;;  %v2165_v19 = vmul.f32 -1.442695, %v265_v16  ;;  %v2928_v58 = vpop.f32.mrb[5].mxu0 }
  0xe4   :  { %2650 = vpow2.f32 %v2165_v19 }
  0xe5   :  { %v2930_v59 = vpop.f32.mrb[6].mxu0 }
  0xe6   :  { %v2932_v60 = vpop.f32.mrb[7].mxu0 }
  0xec   :  { %v2649_v18 = vpop.eup %2648 }
  0xed   :  { %275 = vrot.lane.b32.xlu0 %v2649_v18, %s2779_s23 }
  0xee   :  { %v2651_v20 = vpop.eup %2650 }
  0xef   :  { %v269_v21 = vadd.f32 1.0, %v2651_v20 }
  0xf1   :  { %2652 = vrcp.f32 %v269_v21  ;;  %v155_v21 = vadd.f32 %v2319_v55, %v2880_v12 }
  0xfb   :  { %v2653_v22 = vpop.eup %2652 }
  0xfc   :  { %v273_v25 = vmul.f32 0.0, %v2653_v22 }
 0x15f   :  { %v276_v23 = vpop.permute.xlu0 %275 }
 0x160   :  { %v278_v24 = vmul.f32 %v2653_v22, %v276_v23 }
 0x162   :  { %280 = vrot.lane.b32.xlu0 %v278_v24, %s2779_s23 }
 0x1d4   :  { %v281_v26 = vpop.permute.xlu0 %280 }
 0x1d5   :  { %v283_v27 = vadd.f32 %v281_v26, %v273_v25 }
 0x1d7   :  { %2654 = vtanh.f32 %v283_v27 }
 0x1e1   :  { %v2655_v28 = vpop.eup %2654 }
 0x1e2   :  { %286 = vrot.lane.b32.xlu1 %v2655_v28, %s2779_s23 }
 0x254   :  { %v287_v29 = vpop.permute.xlu1 %286 }
 0x255   :  { %v289_v30 = vmul.f32 %v2653_v22, %v287_v29 }
 0x257   :  { %291 = vrot.lane.b32.xlu1 %v289_v30, %s2780_s3 }
 0x2c9   :  { %v292_v31 = vpop.permute.xlu1 %291 }
 0x2ca   :  { %294 = vst.msk [vmem:[#allocation3] sm:$0xff] %vm191_vm2, %v292_v31  ;;  %2346 = vmatmul.mubr.msk.f32.vlgmr.msra.gmra.mrb[2].mxu1 %vm191_vm2, %v292_v31 }
 0x2cb   :  { %2553 = vmatpush3.bf16.msra.mxu1 %v2843_v5  ;;  %2367 = vmatprep.mubr.msk.f32.mxu1 %vm2777_vm1, %v2778_v4 }
 0x2cc   :  { %2554 = vmatprep.subr.bf16.mxu1 %v2776_v0 }
 0x2cf   :  { %2556 = vmatpush3.bf16.msra.mxu1 %v2860_v10 }
 0x2d0   :  { %2563 = vmatprep.subr.bf16.mxu1 %v2776_v0 }
 0x39d   :  { %v369_v33 = vpop.f32.mrb[2].mxu1 }
 0x39e   :  { %v373_v34 = vadd.f32 %v369_v33, %v145_v32  ;;  %v2347_v35 = vpop.f32.mrb[3].mxu1 }
 0x3a0   :  { %2656 = vtanh.f32 %v373_v34  ;;  %v2167_v37 = vmul.f32 -1.442695, %v373_v34 }
 0x3a2   :  { %2658 = vpow2.f32 %v2167_v37 }
 0x3aa   :  { %v2657_v36 = vpop.eup %2656 }
 0x3ab   :  { %383 = vrot.lane.b32.xlu0 %v2657_v36, %s2779_s23 }
 0x3ac   :  { %v2659_v38 = vpop.eup %2658 }
 0x3ad   :  { %v377_v39 = vadd.f32 1.0, %v2659_v38 }
 0x3af   :  { %2660 = vrcp.f32 %v377_v39  ;;  %v160_v39 = vadd.f32 %v2880_v12, %v2928_v58  ;;  %v165_v58 = vadd.f32 %v2926_v57, %v2880_v12 }
 0x3b9   :  { %v2661_v40 = vpop.eup %2660 }
 0x3ba   :  { %v381_v43 = vmul.f32 %v2661_v40, %v283_v27 }
 0x41d   :  { %v384_v41 = vpop.permute.xlu0 %383 }
 0x41e   :  { %v386_v42 = vmul.f32 %v2661_v40, %v384_v41 }
 0x420   :  { %388 = vrot.lane.b32.xlu1 %v386_v42, %s2779_s23 }
 0x492   :  { %v389_v44 = vpop.permute.xlu1 %388 }
 0x493   :  { %v391_v45 = vadd.f32 %v389_v44, %v381_v43 }
 0x495   :  { %2662 = vtanh.f32 %v391_v45 }
 0x49f   :  { %v2663_v52 = vpop.eup %2662 }
 0x4a0   :  { %394 = vrot.lane.b32.xlu0 %v2663_v52, %s2779_s23 }
 0x512   :  { %v395_v53 = vpop.permute.xlu0 %394 }
 0x513   :  { %v397_v54 = vmul.f32 %v2661_v40, %v395_v53 }
 0x515   :  { %399 = vrot.lane.b32.xlu1 %v397_v54, %s2780_s3 }
 0x587   :  { %v400_v61 = vpop.permute.xlu1 %399 }
 0x588   :  { %403 = vst.msk [vmem:[#allocation3 + $0x8] sm:$0xff] %vm191_vm2, %v400_v61  ;;  %2357 = vmatmul.mubr.msk.f32.vlgmr.msra.gmra.mrb[8].mxu0 %vm191_vm2, %v400_v61 }
 0x589   :  { %2559 = vmatpush3.bf16.msra.mxu0 %v2843_v5  ;;  %2378 = vmatprep.mubr.msk.f32.mxu0 %vm2777_vm1, %v2778_v4 }
 0x58a   :  { %2560 = vmatprep.subr.bf16.mxu0 %v2776_v0 }
 0x58d   :  { %2562 = vmatpush3.bf16.msra.mxu0 %v2860_v10 }
 0x58e   :  { %2569 = vmatprep.subr.bf16.mxu0 %v2776_v0 }
 0x65b   :  { %v478_v63 = vpop.f32.mrb[8].mxu0 }
 0x65c   :  { %v482_v1 = vadd.f32 %v478_v63, %v150_v62  ;;  %v2358_v2 = vpop.f32.mrb[9].mxu0 }
 0x65e   :  { %2664 = vtanh.f32 %v482_v1  ;;  %v2169_v6 = vmul.f32 -1.442695, %v482_v1 }
 0x660   :  { %2666 = vpow2.f32 %v2169_v6 }
 0x668   :  { %v2665_v3 = vpop.eup %2664 }
 0x669   :  { %492 = vrot.lane.b32.xlu0 %v2665_v3, %s2779_s23 }
 0x66a   :  { %v2667_v7 = vpop.eup %2666 }
 0x66b   :  { %v486_v8 = vadd.f32 1.0, %v2667_v7 }
 0x66d   :  { %2668 = vrcp.f32 %v486_v8 }
 0x677   :  { %v2669_v9 = vpop.eup %2668 }
 0x678   :  { %v490_v14 = vmul.f32 %v2669_v9, %v391_v45 }
 0x6db   :  { %v493_v11 = vpop.permute.xlu0 %492 }
 0x6dc   :  { %v495_v13 = vmul.f32 %v2669_v9, %v493_v11  ;;  %v1066_v11 = vld [vmem:[%s3200_s4] sm:$0xff] }
 0x6de   :  { %497 = vrot.lane.b32.xlu1 %v495_v13, %s2779_s23  ;;  %v1067_v13 = vld [vmem:[%s3200_s4 + $0x8] sm:$0xff] }
 0x750   :  { %v498_v15 = vpop.permute.xlu1 %497 }
 0x751   :  { %v500_v16 = vadd.f32 %v498_v15, %v490_v14  ;;  %v2581_v14 = vpack.c.bf16 %v1067_v13, %v1066_v11 }
 0x753   :  { %2670 = vtanh.f32 %v500_v16 }
 0x75d   :  { %v2671_v17 = vpop.eup %2670 }
 0x75e   :  { %503 = vrot.lane.b32.xlu0 %v2671_v17, %s2779_s23 }
 0x7d0   :  { %v504_v18 = vpop.permute.xlu0 %503 }
 0x7d1   :  { %v506_v19 = vmul.f32 %v2669_v9, %v504_v18  ;;  %v1068_v18 = vld [vmem:[%s3200_s4 + $0x10] sm:$0xff] }
 0x7d3   :  { %508 = vrot.lane.b32.xlu1 %v506_v19, %s2780_s3  ;;  %v1069_v19 = vld [vmem:[%s3200_s4 + $0x18] sm:$0xff] }
 0x845   :  { %v509_v20 = vpop.permute.xlu1 %508 }
 0x846   :  { %512 = vst.msk [vmem:[#allocation3 + $0x10] sm:$0xff] %vm191_vm2, %v509_v20  ;;  %2368 = vmatmul.mubr.msk.f32.vlgmr.msra.gmra.mrb[4].mxu1 %vm191_vm2, %v509_v20  ;;  %v2585_v20 = vpack.c.bf16 %v1069_v19, %v1068_v18 }
 0x847   :  { %2565 = vmatpush3.bf16.msra.mxu1 %v2843_v5  ;;  %2389 = vmatprep.mubr.msk.f32.mxu1 %vm2777_vm1, %v2778_v4 }
 0x848   :  { %2566 = vmatprep.subr.bf16.mxu1 %v2776_v0 }
 0x84b   :  { %2568 = vmatpush3.bf16.msra.mxu1 %v2860_v10 }
 0x84c   :  { %2575 = vmatprep.subr.bf16.mxu1 %v2776_v0 }
 0x919   :  { %v587_v22 = vpop.f32.mrb[4].mxu1 }
 0x91a   :  { %v591_v23 = vadd.f32 %v587_v22, %v155_v21  ;;  %v2369_v24 = vpop.f32.mrb[5].mxu1  ;;  %v1058_v22 = vld [vmem:[#allocation3] sm:$0xff] }
 0x91b   :  { %v1060_v24 = vld [vmem:[#allocation3 + $0x10] sm:$0xff] }
 0x91c   :  { %2672 = vtanh.f32 %v591_v23  ;;  %v2171_v26 = vmul.f32 -1.442695, %v591_v23  ;;  %v1059_v23 = vld [vmem:[#allocation3 + $0x8] sm:$0xff] }
 0x91e   :  { %2674 = vpow2.f32 %v2171_v26 }
 0x926   :  { %v2673_v25 = vpop.eup %2672 }
 0x927   :  { %601 = vrot.lane.b32.xlu0 %v2673_v25, %s2779_s23 }
 0x928   :  { %v2675_v27 = vpop.eup %2674 }
 0x929   :  { %v595_v28 = vadd.f32 1.0, %v2675_v27 }
 0x92b   :  { %2676 = vrcp.f32 %v595_v28  ;;  %v170_v28 = vadd.f32 %v2880_v12, %v2932_v60 }
 0x935   :  { %v2677_v29 = vpop.eup %2676 }
 0x936   :  { %v599_v32 = vmul.f32 %v2677_v29, %v500_v16 }
 0x999   :  { %v602_v30 = vpop.permute.xlu0 %601 }
 0x99a   :  { %v604_v31 = vmul.f32 %v2677_v29, %v602_v30 }
 0x99c   :  { %606 = vrot.lane.b32.xlu1 %v604_v31, %s2779_s23 }
 0xa0e   :  { %v607_v33 = vpop.permute.xlu1 %606 }
 0xa0f   :  { %v609_v34 = vadd.f32 %v607_v33, %v599_v32 }
 0xa11   :  { %2678 = vtanh.f32 %v609_v34 }
 0xa1b   :  { %v2679_v35 = vpop.eup %2678 }
 0xa1c   :  { %612 = vrot.lane.b32.xlu0 %v2679_v35, %s2779_s23 }
 0xa8e   :  { %v613_v36 = vpop.permute.xlu0 %612 }
 0xa8f   :  { %v615_v37 = vmul.f32 %v2677_v29, %v613_v36 }
 0xa91   :  { %617 = vrot.lane.b32.xlu1 %v615_v37, %s2780_s3 }
 0xb03   :  { %v618_v38 = vpop.permute.xlu1 %617 }
 0xb04   :  { %621 = vst.msk [vmem:[#allocation3 + $0x18] sm:$0xff] %vm191_vm2, %v618_v38  ;;  %2379 = vmatmul.mubr.msk.f32.vlgmr.msra.gmra.mrb[10].mxu0 %vm191_vm2, %v618_v38 }
 0xb05   :  { %2571 = vmatpush3.bf16.msra.mxu0 %v2843_v5  ;;  %2400 = vmatprep.mubr.msk.f32.mxu0 %vm2777_vm1, %v2778_v4 }
 0xb06   :  { %2572 = vmatprep.subr.bf16.mxu0 %v2776_v0 }
 0xb09   :  { %2574 = vmatpush3.bf16.msra.mxu0 %v2860_v10 }
 0xb0a   :  { %2582 = vmatprep.subr.bf16.mxu0 %v2581_v14 }
 0xb0b   :  { %v1061_v25 = vld [vmem:[#allocation3 + $0x18] sm:$0xff] }
 0xbd7   :  { %v696_v40 = vpop.f32.mrb[10].mxu0 }
 0xbd8   :  { %v700_v41 = vadd.f32 %v696_v40, %v160_v39  ;;  %v2380_v42 = vpop.f32.mrb[11].mxu0 }
 0xbda   :  { %2680 = vtanh.f32 %v700_v41  ;;  %v2173_v44 = vmul.f32 -1.442695, %v700_v41 }
 0xbdc   :  { %2682 = vpow2.f32 %v2173_v44 }
 0xbe4   :  { %v2681_v43 = vpop.eup %2680 }
 0xbe5   :  { %710 = vrot.lane.b32.xlu0 %v2681_v43, %s2779_s23 }
 0xbe6   :  { %v2683_v45 = vpop.eup %2682 }
 0xbe7   :  { %v704_v46 = vadd.f32 1.0, %v2683_v45 }
 0xbe9   :  { %2684 = vrcp.f32 %v704_v46 }
 0xbf3   :  { %v2685_v47 = vpop.eup %2684 }
 0xbf4   :  { %v708_v50 = vmul.f32 %v2685_v47, %v609_v34 }
 0xc57   :  { %v711_v48 = vpop.permute.xlu0 %710 }
 0xc58   :  { %v713_v49 = vmul.f32 %v2685_v47, %v711_v48  ;;  %v1215_v48 = vld [vmem:[%s3201_s5] sm:$0xff] }
 0xc5a   :  { %715 = vrot.lane.b32.xlu1 %v713_v49, %s2779_s23  ;;  %v1216_v49 = vld [vmem:[%s3201_s5 + $0x8] sm:$0xff] }
 0xccc   :  { %v716_v51 = vpop.permute.xlu1 %715 }
 0xccd   :  { %v718_v52 = vadd.f32 %v716_v51, %v708_v50  ;;  %v3032_v50 = vpack.c.bf16 %v1216_v49, %v1215_v48  ;;  %v1217_v51 = vld [vmem:[%s3201_s5 + $0x10] sm:$0xff] }
 0xccf   :  { %2686 = vtanh.f32 %v718_v52 }
 0xcd9   :  { %v2687_v53 = vpop.eup %2686 }
 0xcda   :  { %721 = vrot.lane.b32.xlu0 %v2687_v53, %s2779_s23 }
 0xd4c   :  { %v722_v54 = vpop.permute.xlu0 %721 }
 0xd4d   :  { %v724_v55 = vmul.f32 %v2685_v47, %v722_v54 }
 0xd4f   :  { %726 = vrot.lane.b32.xlu1 %v724_v55, %s2780_s3 }
 0xdc1   :  { %v727_v56 = vpop.permute.xlu1 %726 }
 0xdc2   :  { %730 = vst.msk [vmem:[#allocation3 + $0x20] sm:$0xff] %vm191_vm2, %v727_v56  ;;  %2390 = vmatmul.mubr.msk.f32.vlgmr.msra.gmra.mrb[6].mxu1 %vm191_vm2, %v727_v56 }
 0xdc3   :  { %2577 = vmatpush3.bf16.msra.mxu1 %v2843_v5  ;;  %2411 = vmatprep.mubr.msk.f32.mxu1 %vm2777_vm1, %v2778_v4 }
 0xdc4   :  { %2578 = vmatprep.subr.bf16.mxu1 %v2776_v0 }
 0xdc7   :  { %2580 = vmatpush3.bf16.msra.mxu1 %v2860_v10 }
 0xdc8   :  { %2589 = vmatprep.subr.bf16.mxu1 %v2776_v0 }
 0xdc9   :  { %v1062_v26 = vld [vmem:[#allocation3 + $0x20] sm:$0xff] }
 0xe95   :  { %v805_v61 = vpop.f32.mrb[6].mxu1 }
 0xe96   :  { %v809_v62 = vadd.f32 %v805_v61, %v165_v58  ;;  %v2391_v63 = vpop.f32.mrb[7].mxu1  ;;  %v175_v61 = vadd.f32 %v2930_v59, %v2880_v12 }
 0xe98   :  { %2688 = vtanh.f32 %v809_v62  ;;  %v2175_v5 = vmul.f32 -1.442695, %v809_v62 }
 0xe9a   :  { %2690 = vpow2.f32 %v2175_v5  ;;  %v3068_v5 = vld [vmem:[%s3202_s6] ss:$0 sm:$0xff] }
 0xea2   :  { %v2689_v1 = vpop.eup %2688 }
 0xea3   :  { %819 = vrot.lane.b32.xlu0 %v2689_v1, %s2779_s23 }
 0xea4   :  { %v2691_v2 = vpop.eup %2690 }
 0xea5   :  { %v813_v3 = vadd.f32 1.0, %v2691_v2 }
 0xea7   :  { %2692 = vrcp.f32 %v813_v3 }
 0xeb1   :  { %v2693_v6 = vpop.eup %2692 }
 0xeb2   :  { %v817_v8 = vmul.f32 %v2693_v6, %v718_v52  ;;  %v1218_v52 = vld [vmem:[%s3201_s5 + $0x18] sm:$0xff] }
 0xeb3   :  { %v3042_v53 = vpack.c.bf16 %v1218_v52, %v1217_v51 }
 0xf15   :  { %v820_v7 = vpop.permute.xlu0 %819 }
 0xf16   :  { %v822_v10 = vmul.f32 %v2693_v6, %v820_v7 }
 0xf18   :  { %824 = vrot.lane.b32.xlu1 %v822_v10, %s2779_s23 }
 0xf8a   :  { %v825_v9 = vpop.permute.xlu1 %824 }
 0xf8b   :  { %v827_v57 = vadd.f32 %v825_v9, %v817_v8 }
 0xf8d   :  { %2694 = vtanh.f32 %v827_v57 }
 0xf97   :  { %v2695_v15 = vpop.eup %2694 }
 0xf98   :  { %830 = vrot.lane.b32.xlu0 %v2695_v15, %s2779_s23 }
0x100a   :  { %v831_v16 = vpop.permute.xlu0 %830 }
0x100b   :  { %v833_v17 = vmul.f32 %v2693_v6, %v831_v16 }
0x100d   :  { %835 = vrot.lane.b32.xlu1 %v833_v17, %s2780_s3 }
0x107f   :  { %v836_v21 = vpop.permute.xlu1 %835 }
0x1080   :  { %839 = vst.msk [vmem:[#allocation3 + $0x28] sm:$0xff] %vm191_vm2, %v836_v21  ;;  %2401 = vmatmul.mubr.msk.f32.vlgmr.msra.gmra.mrb[12].mxu0 %vm191_vm2, %v836_v21 }
0x1081   :  { %2584 = vmatpush3.bf16.msra.mxu0 %v2581_v14  ;;  %2422 = vmatprep.mubr.msk.f32.mxu0 %vm191_vm2, %v1058_v22 }
0x1082   :  { %2586 = vmatprep.subr.bf16.mxu0 %v2585_v20 }
0x1085   :  { %2588 = vmatpush3.bf16.msra.mxu0 %v2585_v20 }
0x1086   :  { %2601 = vmatprep.subr.bf16.mxu0 %v2776_v0 }
0x1087   :  { %v1063_v27 = vld [vmem:[#allocation3 + $0x28] sm:$0xff] }
0x1088   :  { %2423 = vmatmul.mubr.msk.f32.vlgmr.msra.gmra.mrb[14].mxu0 %vm191_vm2, %v1059_v23 }
0x1089   :  { %2425 = vmatprep.mubr.msk.f32.mxu0 %vm191_vm2, %v1060_v24  ;;  %2603 = vmatpush3.bf16.msra.mxu0 %v3032_v50 }
0x108a   :  { %2604 = vmatprep.subr.bf16.mxu0 %v2776_v0 }
0x108c   :  { %2426 = vmatmul.mubr.msk.f32.gmra.mrb[16].mxu0 %vm191_vm2, %v1061_v25 }
0x108d   :  { %2428 = vmatprep.mubr.msk.f32.mxu0 %vm191_vm2, %v1062_v26  ;;  %2606 = vmatpush3.bf16.msra.mxu0 %v3042_v53 }
0x108e   :  { %2613 = vmatprep.subr.bf16.mxu0 %v2776_v0 }
0x1090   :  { %2429 = vmatmul.mubr.msk.f32.gmra.mrb[18].mxu0 %vm191_vm2, %v1063_v27 }
0x1153   :  { %v914_v29 = vpop.f32.mrb[12].mxu0 }
0x1154   :  { %v918_v30 = vadd.f32 %v914_v29, %v170_v28  ;;  %v2402_v31 = vpop.f32.mrb[13].mxu0 }
0x1156   :  { %2696 = vtanh.f32 %v918_v30  ;;  %v2177_v39 = vmul.f32 -1.442695, %v918_v30 }
0x1158   :  { %2698 = vpow2.f32 %v2177_v39 }
0x115b   :  { %v3010_v32 = vpop.f32.mrb[14].mxu0 }
0x115c   :  { %v1167_v33 = vpop.f32.mrb[15].mxu0 }
0x115d   :  { %v1168_v2 = vadd.f32 %v3068_v5, %v1167_v33 }
0x115f   :  { %v3012_v34 = vpop.f32.mrb[16].mxu0 }
0x1160   :  { %v2697_v35 = vpop.eup %2696  ;;  %v3014_v36 = vpop.f32.mrb[17].mxu0 }
0x1161   :  { %928 = vrot.lane.b32.xlu0 %v2697_v35, %s2779_s23  ;;  %v1173_v35 = vadd.f32 %v3010_v32, %v3068_v5 }
0x1162   :  { %v2699_v60 = vpop.eup %2698 }
0x1163   :  { %v3017_v37 = vpop.f32.mrb[18].mxu0  ;;  %v922_v40 = vadd.f32 1.0, %v2699_v60 }
0x1164   :  { %v3019_v38 = vpop.f32.mrb[19].mxu0 }
0x1165   :  { %2700 = vrcp.f32 %v922_v40 }
0x116f   :  { %v2701_v41 = vpop.eup %2700 }
0x1170   :  { %v926_v44 = vmul.f32 %v2701_v41, %v827_v57 }
0x11d3   :  { %v929_v42 = vpop.permute.xlu0 %928 }
0x11d4   :  { %v931_v43 = vmul.f32 %v2701_v41, %v929_v42 }
0x11d6   :  { %933 = vrot.lane.b32.xlu1 %v931_v43, %s2779_s23 }
0x1248   :  { %v934_v45 = vpop.permute.xlu1 %933 }
0x1249   :  { %v3022_v46 = vadd.f32 %v934_v45, %v926_v44 }
0x124b   :  { %2702 = vtanh.f32 %v3022_v46 }
0x1255   :  { %v2703_v47 = vpop.eup %2702 }
0x1256   :  { %939 = vrot.lane.b32.xlu0 %v2703_v47, %s2779_s23 }
0x12c8   :  { %v940_v54 = vpop.permute.xlu0 %939 }
0x12c9   :  { %v942_v55 = vmul.f32 %v2701_v41, %v940_v54 }
0x12cb   :  { %944 = vrot.lane.b32.xlu1 %v942_v55, %s2780_s3 }
0x133d   :  { %v945_v56 = vpop.permute.xlu1 %944 }
0x133e   :  { %948 = vst.msk [vmem:[#allocation3 + $0x30] sm:$0xff] %vm191_vm2, %v945_v56  ;;  %2412 = vmatmul.mubr.msk.f32.vlgmr.msra.gmra.mrb[8].mxu1 %vm191_vm2, %v945_v56 }
0x133f   :  { %2591 = vmatpush3.bf16.msra.mxu1 %v3032_v50  ;;  %2442 = vmatprep.mubr.msk.f32.mxu1 %vm2777_vm1, %v2778_v4 }
0x1340   :  { %2592 = vmatprep.subr.bf16.mxu1 %v2776_v0 }
0x1343   :  { %2594 = vmatpush3.bf16.msra.mxu1 %v3042_v53 }
0x1344   :  { %2595 = vmatprep.subr.bf16.mxu1 %v2776_v0 }
0x1345   :  { %v1064_v58 = vld [vmem:[#allocation3 + $0x30] sm:$0xff] }
0x1346   :  { %2443 = vmatmul.mubr.f32.vlgmr.msra.gmra.mrb[10].mxu1 %v2778_v4  ;;  %2431 = vmatprep.mubr.msk.f32.mxu0 %vm191_vm2, %v1064_v58 }
0x1347   :  { %2597 = vmatpush3.bf16.msra.mxu1 %v3032_v50  ;;  %2453 = vmatprep.mubr.msk.f32.mxu1 %vm2777_vm1, %v2778_v4 }
0x1348   :  { %2598 = vmatprep.subr.bf16.mxu1 %v2776_v0 }
0x134b   :  { %2600 = vmatpush3.bf16.msra.mxu1 %v3042_v53 }
0x134c   :  { %2607 = vmatprep.subr.bf16.mxu1 %v2776_v0 }
0x1411   :  { %v1023_v62 = vpop.f32.mrb[8].mxu1 }
0x1412   :  { %v1027_v63 = vadd.f32 %v1023_v62, %v175_v61  ;;  %v2413_v1 = vpop.f32.mrb[9].mxu1 }
0x1414   :  { %v2179_v18 = vmul.f32 -1.442695, %v1027_v63 }
0x1419   :  { %v1285_v3 = vpop.f32.mrb[10].mxu1 }
0x141a   :  { %v1289_v6 = vadd.f32 %v1285_v3, %v1168_v2  ;;  %v2444_v7 = vpop.f32.mrb[11].mxu1 }
0x141c   :  { %2704 = vtanh.f32 %v1289_v6  ;;  %v2189_v8 = vmul.f32 -1.442695, %v1289_v6 }
0x141e   :  { %2706 = vpow2.f32 %v2189_v8 }
0x1426   :  { %v2705_v10 = vpop.eup %2704 }
0x1427   :  { %1299 = vrot.lane.b32.xlu0 %v2705_v10, %s2779_s23 }
0x1428   :  { %v2707_v12 = vpop.eup %2706 }
0x1429   :  { %v1293_v59 = vadd.f32 1.0, %v2707_v12 }
0x142b   :  { %2708 = vrcp.f32 %v1293_v59 }
0x1435   :  { %v2709_v9 = vpop.eup %2708 }
0x1436   :  { %v1297_v13 = vmul.f32 0.0, %v2709_v9 }
0x1499   :  { %v1300_v57 = vpop.permute.xlu0 %1299 }
0x149a   :  { %v1302_v11 = vmul.f32 %v2709_v9, %v1300_v57 }
0x149c   :  { %1304 = vrot.lane.b32.xlu1 %v1302_v11, %s2779_s23 }
0x150e   :  { %v1305_v14 = vpop.permute.xlu1 %1304 }
0x150f   :  { %v1307_v15 = vadd.f32 %v1305_v14, %v1297_v13 }
0x1511   :  { %2710 = vtanh.f32 %v1307_v15 }
0x1512   :  { %2712 = vtanh.f32 %v1027_v63  ;;  %v1178_v63 = vadd.f32 %v3068_v5, %v3014_v36 }
0x1513   :  { %2714 = vpow2.f32 %v2179_v18 }
0x151b   :  { %v2711_v16 = vpop.eup %2710 }
0x151c   :  { %1310 = vrot.lane.b32.xlu0 %v2711_v16, %s2779_s23  ;;  %v2713_v17 = vpop.eup %2712 }
0x151d   :  { %v2715_v19 = vpop.eup %2714 }
0x151e   :  { %v1031_v20 = vadd.f32 1.0, %v2715_v19 }
0x1520   :  { %1037 = vrot.lane.b32.xlu0 %v2713_v17, %s2779_s23  ;;  %2716 = vrcp.f32 %v1031_v20  ;;  %v1183_v17 = vadd.f32 %v3012_v34, %v3068_v5 }
0x152a   :  { %v2717_v23 = vpop.eup %2716 }
0x152b   :  { %v1035_v27 = vmul.f32 %v2717_v23, %v3022_v46 }
0x158e   :  { %v1311_v21 = vpop.permute.xlu0 %1310 }
0x158f   :  { %v1313_v22 = vmul.f32 %v2709_v9, %v1311_v21 }
0x1591   :  { %1315 = vrot.lane.b32.xlu1 %v1313_v22, %s2780_s3 }
0x1592   :  { %v1038_v24 = vpop.permute.xlu0 %1037 }
0x1593   :  { %v1040_v25 = vmul.f32 %v2717_v23, %v1038_v24 }
0x1595   :  { %1042 = vrot.lane.b32.xlu0 %v1040_v25, %s2779_s23 }
0x1603   :  { %v1316_v26 = vpop.permute.xlu1 %1315 }
0x1604   :  { %1318 = vst.msk [vmem:[#allocation3] sm:$0xff] %vm191_vm2, %v1316_v26  ;;  %2454 = vmatmul.mubr.msk.f32.vlgmr.msra.gmra.mrb[12].mxu1 %vm191_vm2, %v1316_v26 }
0x1605   :  { %2609 = vmatpush3.bf16.msra.mxu1 %v3032_v50  ;;  %2475 = vmatprep.mubr.msk.f32.mxu1 %vm2777_vm1, %v2778_v4 }
0x1606   :  { %2610 = vmatprep.subr.bf16.mxu1 %v2776_v0 }
0x1607   :  { %v1043_v28 = vpop.permute.xlu0 %1042 }
0x1608   :  { %v1045_v29 = vadd.f32 %v1043_v28, %v1035_v27 }
0x1609   :  { %2612 = vmatpush3.bf16.msra.mxu1 %v3042_v53 }
0x160a   :  { %2718 = vtanh.f32 %v1045_v29  ;;  %2619 = vmatprep.subr.bf16.mxu1 %v2776_v0 }
0x1614   :  { %v2719_v30 = vpop.eup %2718 }
0x1615   :  { %1048 = vrot.lane.b32.xlu0 %v2719_v30, %s2779_s23 }
0x1687   :  { %v1049_v31 = vpop.permute.xlu0 %1048 }
0x1688   :  { %v1051_v33 = vmul.f32 %v2717_v23, %v1049_v31 }
0x168a   :  { %1053 = vrot.lane.b32.xlu0 %v1051_v33, %s2780_s3 }
0x16d7   :  { %v1392_v39 = vpop.f32.mrb[12].mxu1 }
0x16d8   :  { %v1396_v60 = vadd.f32 %v1392_v39, %v1173_v35  ;;  %v2455_v40 = vpop.f32.mrb[13].mxu1  ;;  %v1188_v39 = vadd.f32 %v3068_v5, %v3019_v38 }
0x16da   :  { %2720 = vtanh.f32 %v1396_v60  ;;  %v2191_v44 = vmul.f32 -1.442695, %v1396_v60 }
0x16dc   :  { %2722 = vpow2.f32 %v2191_v44 }
0x16e4   :  { %v2721_v41 = vpop.eup %2720 }
0x16e5   :  { %1406 = vrot.lane.b32.xlu1 %v2721_v41, %s2779_s23 }
0x16e6   :  { %v2723_v45 = vpop.eup %2722 }
0x16e7   :  { %v1400_v32 = vadd.f32 1.0, %v2723_v45 }
0x16e9   :  { %2724 = vrcp.f32 %v1400_v32 }
0x16f3   :  { %v2725_v46 = vpop.eup %2724 }
0x16f4   :  { %v1404_v49 = vmul.f32 %v2725_v46, %v1307_v15 }
0x16fc   :  { %v1054_v42 = vpop.permute.xlu0 %1053 }
0x16fd   :  { %1057 = vst.msk [vmem:[#allocation3 + $0x38] sm:$0xff] %vm191_vm2, %v1054_v42 }
0x1704   :  { %v1065_v43 = vld [vmem:[#allocation3 + $0x38] sm:$0xff] }
0x1705   :  { %2432 = vmatmul.mubr.msk.f32.gmra.mrb[20].mxu0 %vm191_vm2, %v1065_v43 }
0x1706   :  { %2464 = vmatprep.mubr.msk.f32.mxu0 %vm2777_vm1, %v2778_v4 }
0x1757   :  { %v1407_v47 = vpop.permute.xlu1 %1406 }
0x1758   :  { %v1409_v48 = vmul.f32 %v2725_v46, %v1407_v47 }
0x175a   :  { %1411 = vrot.lane.b32.xlu1 %v1409_v48, %s2779_s23 }
0x17cc   :  { %v1412_v51 = vpop.permute.xlu1 %1411 }
0x17cd   :  { %v1414_v52 = vadd.f32 %v1412_v51, %v1404_v49 }
0x17cf   :  { %2726 = vtanh.f32 %v1414_v52 }
0x17d8   :  { %v3096_v54 = vpop.f32.mrb[20].mxu0 }
0x17d9   :  { %v2727_v55 = vpop.eup %2726  ;;  %v3098_v56 = vpop.f32.mrb[21].mxu0 }
0x17da   :  { %1417 = vrot.lane.b32.xlu1 %v2727_v55, %s2779_s23 }
0x184c   :  { %v1418_v58 = vpop.permute.xlu1 %1417 }
0x184d   :  { %v1420_v61 = vmul.f32 %v2725_v46, %v1418_v58 }
0x184f   :  { %1422 = vrot.lane.b32.xlu1 %v1420_v61, %s2780_s3  ;;  %v1193_v61 = vadd.f32 %v3017_v37, %v3068_v5 }
0x18c1   :  { %v1423_v62 = vpop.permute.xlu1 %1422 }
0x18c2   :  { %1425 = vst.msk [vmem:[#allocation3 + $0x8] sm:$0xff] %vm191_vm2, %v1423_v62  ;;  %2465 = vmatmul.mubr.msk.f32.vlgmr.msra.gmra.mrb[22].mxu0 %vm191_vm2, %v1423_v62 }
0x18c3   :  { %2615 = vmatpush3.bf16.msra.mxu0 %v3032_v50  ;;  %2486 = vmatprep.mubr.msk.f32.mxu0 %vm2777_vm1, %v2778_v4 }
0x18c4   :  { %2616 = vmatprep.subr.bf16.mxu0 %v2776_v0 }
0x18c7   :  { %2618 = vmatpush3.bf16.msra.mxu0 %v3042_v53 }
0x18c8   :  { %2625 = vmatprep.subr.bf16.mxu0 %v2776_v0 }
0x1995   :  { %v1499_v1 = vpop.f32.mrb[22].mxu0 }
0x1996   :  { %v1503_v2 = vadd.f32 %v1499_v1, %v1178_v63  ;;  %v2466_v3 = vpop.f32.mrb[23].mxu0 }
0x1998   :  { %2728 = vtanh.f32 %v1503_v2  ;;  %v2193_v7 = vmul.f32 -1.442695, %v1503_v2 }
0x199a   :  { %2730 = vpow2.f32 %v2193_v7 }
0x19a2   :  { %v2729_v6 = vpop.eup %2728 }
0x19a3   :  { %1513 = vrot.lane.b32.xlu0 %v2729_v6, %s2779_s23 }
0x19a4   :  { %v2731_v10 = vpop.eup %2730 }
0x19a5   :  { %v1507_v8 = vadd.f32 1.0, %v2731_v10 }
0x19a7   :  { %2732 = vrcp.f32 %v1507_v8 }
0x19b1   :  { %v2733_v12 = vpop.eup %2732 }
0x19b2   :  { %v1511_v57 = vmul.f32 %v2733_v12, %v1414_v52 }
0x1a15   :  { %v1514_v59 = vpop.permute.xlu0 %1513 }
0x1a16   :  { %v1516_v9 = vmul.f32 %v2733_v12, %v1514_v59 }
0x1a18   :  { %1518 = vrot.lane.b32.xlu1 %v1516_v9, %s2779_s23 }
0x1a8a   :  { %v1519_v11 = vpop.permute.xlu1 %1518 }
0x1a8b   :  { %v1521_v36 = vadd.f32 %v1519_v11, %v1511_v57 }
0x1a8d   :  { %2734 = vtanh.f32 %v1521_v36 }
0x1a97   :  { %v2735_v13 = vpop.eup %2734 }
0x1a98   :  { %1524 = vrot.lane.b32.xlu0 %v2735_v13, %s2779_s23 }
0x1b0a   :  { %v1525_v14 = vpop.permute.xlu0 %1524 }
0x1b0b   :  { %v1527_v15 = vmul.f32 %v2733_v12, %v1525_v14 }
0x1b0d   :  { %1529 = vrot.lane.b32.xlu1 %v1527_v15, %s2780_s3 }
0x1b7f   :  { %v1530_v16 = vpop.permute.xlu1 %1529 }
0x1b80   :  { %1532 = vst.msk [vmem:[#allocation3 + $0x10] sm:$0xff] %vm191_vm2, %v1530_v16  ;;  %2476 = vmatmul.mubr.msk.f32.vlgmr.msra.gmra.mrb[14].mxu1 %vm191_vm2, %v1530_v16 }
0x1b81   :  { %2621 = vmatpush3.bf16.msra.mxu1 %v3032_v50  ;;  %2497 = vmatprep.mubr.msk.f32.mxu1 %vm2777_vm1, %v2778_v4 }
0x1b82   :  { %2622 = vmatprep.subr.bf16.mxu1 %v2776_v0 }
0x1b85   :  { %2624 = vmatpush3.bf16.msra.mxu1 %v3042_v53 }
0x1b86   :  { %2631 = vmatprep.subr.bf16.mxu1 %v2776_v0 }
0x1c53   :  { %v1606_v18 = vpop.f32.mrb[14].mxu1 }
0x1c54   :  { %v1610_v19 = vadd.f32 %v1606_v18, %v1183_v17  ;;  %v2477_v20 = vpop.f32.mrb[15].mxu1 }
0x1c56   :  { %2736 = vtanh.f32 %v1610_v19  ;;  %v2195_v22 = vmul.f32 -1.442695, %v1610_v19 }
0x1c58   :  { %2738 = vpow2.f32 %v2195_v22 }
0x1c60   :  { %v2737_v21 = vpop.eup %2736 }
0x1c61   :  { %1620 = vrot.lane.b32.xlu0 %v2737_v21, %s2779_s23 }
0x1c62   :  { %v2739_v23 = vpop.eup %2738 }
0x1c63   :  { %v1614_v24 = vadd.f32 1.0, %v2739_v23 }
0x1c65   :  { %2740 = vrcp.f32 %v1614_v24 }
0x1c6f   :  { %v2741_v25 = vpop.eup %2740 }
0x1c70   :  { %v1618_v28 = vmul.f32 %v2741_v25, %v1521_v36  ;;  %v1198_v36 = vadd.f32 %v3068_v5, %v3098_v56 }
0x1cd3   :  { %v1621_v26 = vpop.permute.xlu0 %1620 }
0x1cd4   :  { %v1623_v27 = vmul.f32 %v2741_v25, %v1621_v26 }
0x1cd6   :  { %1625 = vrot.lane.b32.xlu1 %v1623_v27, %s2779_s23 }
0x1d48   :  { %v1626_v29 = vpop.permute.xlu1 %1625 }
0x1d49   :  { %v1628_v34 = vadd.f32 %v1626_v29, %v1618_v28  ;;  %v1203_v28 = vadd.f32 %v3096_v54, %v3068_v5  ;;  %v2068_v54 = vld [vmem:[%s3203_s7] sm:$0xff] }
0x1d4b   :  { %2742 = vtanh.f32 %v1628_v34 }
0x1d55   :  { %v2743_v30 = vpop.eup %2742 }
0x1d56   :  { %1631 = vrot.lane.b32.xlu0 %v2743_v30, %s2779_s23 }
0x1dc8   :  { %v1632_v31 = vpop.permute.xlu0 %1631 }
0x1dc9   :  { %v1634_v33 = vmul.f32 %v2741_v25, %v1632_v31 }
0x1dcb   :  { %1636 = vrot.lane.b32.xlu1 %v1634_v33, %s2780_s3 }
0x1e3d   :  { %v1637_v35 = vpop.permute.xlu1 %1636 }
0x1e3e   :  { %1639 = vst.msk [vmem:[#allocation3 + $0x18] sm:$0xff] %vm191_vm2, %v1637_v35  ;;  %2487 = vmatmul.mubr.msk.f32.vlgmr.msra.gmra.mrb[24].mxu0 %vm191_vm2, %v1637_v35 }
0x1e3f   :  { %2627 = vmatpush3.bf16.msra.mxu0 %v3032_v50  ;;  %2508 = vmatprep.mubr.msk.f32.mxu0 %vm2777_vm1, %v2778_v4 }
0x1e40   :  { %2628 = vmatprep.subr.bf16.mxu0 %v2776_v0 }
0x1e43   :  { %2630 = vmatpush3.bf16.msra.mxu0 %v3042_v53 }
0x1e44   :  { %2637 = vmatprep.subr.bf16.mxu0 %v2776_v0 }
0x1f11   :  { %v1713_v60 = vpop.f32.mrb[24].mxu0 }
0x1f12   :  { %v1717_v40 = vadd.f32 %v1713_v60, %v1188_v39  ;;  %v2488_v41 = vpop.f32.mrb[25].mxu0 }
0x1f14   :  { %2744 = vtanh.f32 %v1717_v40  ;;  %v2197_v43 = vmul.f32 -1.442695, %v1717_v40 }
0x1f16   :  { %2746 = vpow2.f32 %v2197_v43 }
0x1f1e   :  { %v2745_v42 = vpop.eup %2744 }
0x1f1f   :  { %1727 = vrot.lane.b32.xlu0 %v2745_v42, %s2779_s23 }
0x1f20   :  { %v2747_v44 = vpop.eup %2746 }
0x1f21   :  { %v1721_v45 = vadd.f32 1.0, %v2747_v44  ;;  %v2069_v44 = vld [vmem:[%s3203_s7 + $0x8] sm:$0xff] }
0x1f23   :  { %2748 = vrcp.f32 %v1721_v45  ;;  %v2070_v45 = vld [vmem:[%s3203_s7 + $0x10] sm:$0xff] }
0x1f2d   :  { %v2749_v32 = vpop.eup %2748 }
0x1f2e   :  { %v1725_v48 = vmul.f32 %v2749_v32, %v1628_v34 }
0x1f91   :  { %v1728_v46 = vpop.permute.xlu0 %1727 }
0x1f92   :  { %v1730_v47 = vmul.f32 %v2749_v32, %v1728_v46  ;;  %v2071_v46 = vld [vmem:[%s3203_s7 + $0x18] sm:$0xff] }
0x1f94   :  { %1732 = vrot.lane.b32.xlu1 %v1730_v47, %s2779_s23  ;;  %v2641_v47 = vpack.c.bf16 %v2071_v46, %v2070_v45 }
0x2006   :  { %v1733_v49 = vpop.permute.xlu1 %1732 }
0x2007   :  { %v1735_v38 = vadd.f32 %v1733_v49, %v1725_v48 }
0x2009   :  { %2750 = vtanh.f32 %v1735_v38 }
0x2013   :  { %v2751_v51 = vpop.eup %2750 }
0x2014   :  { %1738 = vrot.lane.b32.xlu0 %v2751_v51, %s2779_s23 }
0x2086   :  { %v1739_v52 = vpop.permute.xlu0 %1738 }
0x2087   :  { %v1741_v55 = vmul.f32 %v2749_v32, %v1739_v52  ;;  %v2638_v32 = vpack.c.bf16 %v2069_v44, %v2068_v54  ;;  %v2204_v52 = vld [vmem:[%s3204_s8] ss:$0 sm:$0xff] }
0x2089   :  { %1743 = vrot.lane.b32.xlu1 %v1741_v55, %s2780_s3 }
0x20fb   :  { %v1744_v58 = vpop.permute.xlu1 %1743 }
0x20fc   :  { %1746 = vst.msk [vmem:[#allocation3 + $0x20] sm:$0xff] %vm191_vm2, %v1744_v58  ;;  %2498 = vmatmul.mubr.msk.f32.vlgmr.msra.gmra.mrb[16].mxu1 %vm191_vm2, %v1744_v58 }
0x20fd   :  { %2633 = vmatpush3.bf16.msra.mxu1 %v3032_v50  ;;  %2519 = vmatprep.mubr.msk.f32.mxu1 %vm2777_vm1, %v2778_v4 }
0x20fe   :  { %2634 = vmatprep.subr.bf16.mxu1 %v2776_v0 }
0x2101   :  { %2636 = vmatpush3.bf16.msra.mxu1 %v3042_v53 }
0x21cf   :  { %v1820_v62 = vpop.f32.mrb[16].mxu1 }
0x21d0   :  { %v1824_v63 = vadd.f32 %v1820_v62, %v1193_v61  ;;  %v2499_v1 = vpop.f32.mrb[17].mxu1 }
0x21d2   :  { %2752 = vtanh.f32 %v1824_v63  ;;  %v2199_v3 = vmul.f32 -1.442695, %v1824_v63 }
0x21d4   :  { %2754 = vpow2.f32 %v2199_v3 }
0x21dc   :  { %v2753_v2 = vpop.eup %2752 }
0x21dd   :  { %1834 = vrot.lane.b32.xlu0 %v2753_v2, %s2779_s23 }
0x21de   :  { %v2755_v50 = vpop.eup %2754 }
0x21df   :  { %v1828_v6 = vadd.f32 1.0, %v2755_v50 }
0x21e1   :  { %2756 = vrcp.f32 %v1828_v6 }
0x21eb   :  { %v2757_v7 = vpop.eup %2756 }
0x21ec   :  { %v1832_v53 = vmul.f32 %v2757_v7, %v1735_v38 }
0x224f   :  { %v1835_v10 = vpop.permute.xlu0 %1834 }
0x2250   :  { %v1837_v8 = vmul.f32 %v2757_v7, %v1835_v10 }
0x2252   :  { %1839 = vrot.lane.b32.xlu1 %v1837_v8, %s2779_s23 }
0x22c4   :  { %v1840_v12 = vpop.permute.xlu1 %1839 }
0x22c5   :  { %v1842_v37 = vadd.f32 %v1840_v12, %v1832_v53 }
0x22c7   :  { %2758 = vtanh.f32 %v1842_v37 }
0x22d1   :  { %v2759_v59 = vpop.eup %2758 }
0x22d2   :  { %1845 = vrot.lane.b32.xlu0 %v2759_v59, %s2779_s23 }
0x2344   :  { %v1846_v9 = vpop.permute.xlu0 %1845 }
0x2345   :  { %v1848_v57 = vmul.f32 %v2757_v7, %v1846_v9 }
0x2347   :  { %1850 = vrot.lane.b32.xlu1 %v1848_v57, %s2780_s3 }
0x23b9   :  { %v1851_v11 = vpop.permute.xlu1 %1850 }
0x23ba   :  { %1853 = vst.msk [vmem:[#allocation3 + $0x28] sm:$0xff] %vm191_vm2, %v1851_v11  ;;  %2509 = vmatmul.mubr.msk.f32.vlgmr.msra.gmra.mrb[26].mxu0 %vm191_vm2, %v1851_v11 }
0x23bb   :  { %2530 = vmatprep.mubr.msk.f32.mxu0 %vm2777_vm1, %v2778_v4  ;;  %2639 = vmatpush3.bf16.msra.mxu0 %v2638_v32 }
0x23bc   :  { %2640 = vmatprep.subr.bf16.mxu0 %v2776_v0 }
0x23bf   :  { %2642 = vmatpush3.bf16.msra.mxu0 %v2641_v47 }
0x248d   :  { %v1927_v13 = vpop.f32.mrb[26].mxu0 }
0x248e   :  { %v1931_v14 = vadd.f32 %v1927_v13, %v1198_v36  ;;  %v2510_v15 = vpop.f32.mrb[27].mxu0 }
0x2490   :  { %2760 = vtanh.f32 %v1931_v14  ;;  %v2201_v17 = vmul.f32 -1.442695, %v1931_v14 }
0x2492   :  { %2762 = vpow2.f32 %v2201_v17 }
0x249a   :  { %v2761_v16 = vpop.eup %2760 }
0x249b   :  { %1941 = vrot.lane.b32.xlu0 %v2761_v16, %s2779_s23 }
0x249c   :  { %v2763_v18 = vpop.eup %2762 }
0x249d   :  { %v1935_v19 = vadd.f32 1.0, %v2763_v18 }
0x249f   :  { %2764 = vrcp.f32 %v1935_v19 }
0x24a9   :  { %v2765_v20 = vpop.eup %2764 }
0x24aa   :  { %v1939_v4 = vmul.f32 %v2765_v20, %v1842_v37 }
0x250d   :  { %v1942_v21 = vpop.permute.xlu0 %1941 }
0x250e   :  { %v1944_v22 = vmul.f32 %v2765_v20, %v1942_v21 }
0x2510   :  { %1946 = vrot.lane.b32.xlu1 %v1944_v22, %s2779_s23 }
0x2582   :  { %v1947_v23 = vpop.permute.xlu1 %1946 }
0x2583   :  { %v1949_v56 = vadd.f32 %v1947_v23, %v1939_v4 }
0x2585   :  { %2766 = vtanh.f32 %v1949_v56 }
0x258f   :  { %v2767_v24 = vpop.eup %2766 }
0x2590   :  { %1952 = vrot.lane.b32.xlu0 %v2767_v24, %s2779_s23 }
0x2602   :  { %v1953_v25 = vpop.permute.xlu0 %1952 }
0x2603   :  { %v1955_v26 = vmul.f32 %v2765_v20, %v1953_v25 }
0x2605   :  { %1957 = vrot.lane.b32.xlu1 %v1955_v26, %s2780_s3 }
0x2677   :  { %v1958_v27 = vpop.permute.xlu1 %1957 }
0x2678   :  { %1960 = vst.msk [vmem:[#allocation3 + $0x30] sm:$0xff] %vm191_vm2, %v1958_v27  ;;  %2520 = vmatmul.mubr.msk.f32.vlgmr.msra.gmra.mrb[18].mxu1 %vm191_vm2, %v1958_v27 }
0x274b   :  { %v2034_v29 = vpop.f32.mrb[18].mxu1 }
0x274c   :  { %v2038_v34 = vadd.f32 %v2034_v29, %v1203_v28  ;;  %v2521_v30 = vpop.f32.mrb[19].mxu1 }
0x274e   :  { %2768 = vtanh.f32 %v2038_v34  ;;  %v2203_v33 = vmul.f32 -1.442695, %v2038_v34 }
0x2750   :  { %2770 = vpow2.f32 %v2203_v33 }
0x2758   :  { %v2769_v31 = vpop.eup %2768 }
0x2759   :  { %2048 = vrot.lane.b32.xlu0 %v2769_v31, %s2779_s23 }
0x275a   :  { %v2771_v35 = vpop.eup %2770 }
0x275b   :  { %v2042_v39 = vadd.f32 1.0, %v2771_v35 }
0x275d   :  { %2772 = vrcp.f32 %v2042_v39 }
0x2767   :  { %v2773_v60 = vpop.eup %2772 }
0x2768   :  { %v2046_v42 = vmul.f32 %v2773_v60, %v1949_v56 }
0x27cb   :  { %v2049_v40 = vpop.permute.xlu0 %2048 }
0x27cc   :  { %v2051_v41 = vmul.f32 %v2773_v60, %v2049_v40 }
0x27ce   :  { %2053 = vrot.lane.b32.xlu1 %v2051_v41, %s2779_s23 }
0x2840   :  { %v2054_v43 = vpop.permute.xlu1 %2053 }
0x2841   :  { %v2056_v5 = vadd.f32 %v2054_v43, %v2046_v42 }
0x2843   :  { %2774 = vtanh.f32 %v2056_v5 }
0x284d   :  { %v2775_v48 = vpop.eup %2774 }
0x284e   :  { %2059 = vrot.lane.b32.xlu0 %v2775_v48, %s2779_s23 }
0x28c0   :  { %v2060_v49 = vpop.permute.xlu0 %2059 }
0x28c1   :  { %v2062_v38 = vmul.f32 %v2773_v60, %v2060_v49 }
0x28c3   :  { %2064 = vrot.lane.b32.xlu1 %v2062_v38, %s2780_s3 }
0x2935   :  { %v2065_v51 = vpop.permute.xlu1 %2064 }
0x2936   :  { %2067 = vst.msk [vmem:[#allocation3 + $0x38] sm:$0xff] %vm191_vm2, %v2065_v51  ;;  %2531 = vmatmul.mubr.msk.f32.vlgmr.msra.gmra.mrb[28].mxu0 %vm191_vm2, %v2065_v51 }
0x2a09   :  { %v2147_v55 = vpop.f32.mrb[28].mxu0 }
0x2a0a   :  { %v2148_v58 = vadd.f32 %v2204_v52, %v2147_v55  ;;  %v2532_v0 = vpop.f32.mrb[29].mxu0 }
0x2a0c   :  { %2151 = vst [vmem:[%s3205_s9] sm:$0xff] %v2148_v58 }

</bundles_post_ra>
